<compile_context>
chip_gen: v5e
topology: v5e:2x2
jax: 0.10.0
libtpu: 0.0.40
codegen_flags: <defaults>
</compile_context>

<pallas_src>
import functools

import jax
import jax.numpy as jnp
from jax import lax
from jax.experimental import pallas as pl
from jax.experimental.pallas import tpu as pltpu


# ----------------------------- Pallas kernel -------------------------------

def fused_mha_kernel(x_ref, wq_ref, wk_ref, wv_ref, bq_ref, bk_ref, bv_ref,
                     proj_w_ref, proj_b_ref, bias_ref,
                     o_ref, head_acc_ref, *, num_heads):
    # x_ref      : (Bw, N, C)  block of Bw windows (f32 in HBM)
    # wq/wk/wv   : (C, C) bf16 (scale folded into wq), bq/bk/bv : (1, C) f32
    # proj_w     : (C, C) bf16, proj_b : (1, C) f32
    # bias_ref   : (H, N, N) f32  precomputed relative-position bias (VMEM-resident)
    # o_ref      : (Bw, N, C)
    # head_acc_ref: (Bw*N, C) bf16 VMEM scratch for head outputs
    Bw, N, C = x_ref.shape
    hd = C // num_heads

    # Leading-dim collapse (N multiple of 8) -> layout-compatible, free.
    x = x_ref[...].reshape(Bw * N, C).astype(jnp.bfloat16)

    # Q/K/V projections: bf16 operands, f32 accumulation. Scale already in wq/bq.
    q = jnp.dot(x, wq_ref[...], preferred_element_type=jnp.float32) + bq_ref[...]
    k = jnp.dot(x, wk_ref[...], preferred_element_type=jnp.float32) + bk_ref[...]
    v = jnp.dot(x, wv_ref[...], preferred_element_type=jnp.float32) + bv_ref[...]

    q = q.astype(jnp.bfloat16).reshape(Bw, N, C)
    k = k.astype(jnp.bfloat16).reshape(Bw, N, C)
    v = v.astype(jnp.bfloat16).reshape(Bw, N, C)

    # Per-head attention, batched over the Bw windows (single batch dim per dot).
    for h in range(num_heads):                       # H=4, statically unrolled
        sl = slice(h * hd, (h + 1) * hd)
        qh = q[:, :, sl]                             # (Bw, N, hd) bf16
        kh = k[:, :, sl]
        vh = v[:, :, sl]

        # logits: contract head dim, Bw is the batch dim (no explicit k transpose)
        s = lax.dot_general(qh, kh, (((2,), (2,)), ((0,), (0,))),
                            preferred_element_type=jnp.float32)       # (Bw, N, N)
        s = s + bias_ref[h]                                           # bcast over Bw

        # numerically-stable softmax in f32
        s = s - jnp.max(s, axis=-1, keepdims=True)
        p = jnp.exp(s)
        p = p * pl.reciprocal(jnp.sum(p, axis=-1, keepdims=True), approx=True)

        oh = lax.dot_general(p.astype(jnp.bfloat16), vh,
                             (((2,), (1,)), ((0,), (0,))),
                             preferred_element_type=jnp.float32)      # (Bw, N, hd)

        # write head output at its static lane offset (no jnp.concatenate)
        head_acc_ref[:, sl] = oh.reshape(Bw * N, hd).astype(jnp.bfloat16)

    # output projection: (Bw*N, C) x (C, C), K=32, bf16 operands, f32 accumulation
    out = jnp.dot(head_acc_ref[...], proj_w_ref[...],
                  preferred_element_type=jnp.float32) + proj_b_ref[...]
    o_ref[...] = out.reshape(Bw, N, C).astype(o_ref.dtype)


def _pick_block_windows(batch, target):
    bw = min(batch, target)
    while batch % bw:
        bw -= 1
    return bw


def fused_mha(x, params, *, num_heads, block_windows=256):
    """x: (B, N, C) f32;  params from init_mha_params;  returns (B, N, C)."""
    B, N, C = x.shape
    H = num_heads
    # Bw windows per grid step (amortizes step overhead; capped for v5e VMEM safety).
    Bw = _pick_block_windows(B, block_windows)
    kernel = functools.partial(fused_mha_kernel, num_heads=num_heads)

    return pl.pallas_call(
        kernel,
        out_shape=jax.ShapeDtypeStruct((B, N, C), x.dtype),
        grid=(B // Bw,),
        in_specs=[
            pl.BlockSpec((Bw, N, C), lambda b: (b, 0, 0)),   # x (window block)
            pl.BlockSpec((C, C), lambda b: (0, 0)),          # wq (resident)
            pl.BlockSpec((C, C), lambda b: (0, 0)),          # wk (resident)
            pl.BlockSpec((C, C), lambda b: (0, 0)),          # wv (resident)
            pl.BlockSpec((1, C), lambda b: (0, 0)),          # bq (resident)
            pl.BlockSpec((1, C), lambda b: (0, 0)),          # bk (resident)
            pl.BlockSpec((1, C), lambda b: (0, 0)),          # bv (resident)
            pl.BlockSpec((C, C), lambda b: (0, 0)),          # proj_w (resident)
            pl.BlockSpec((1, C), lambda b: (0, 0)),          # proj_b (resident)
            pl.BlockSpec((H, N, N), lambda b: (0, 0, 0)),    # rel-pos bias (resident)
        ],
        out_specs=pl.BlockSpec((Bw, N, C), lambda b: (b, 0, 0)),
        scratch_shapes=[pltpu.VMEM((Bw * N, C), jnp.bfloat16)],
        compiler_params=pltpu.CompilerParams(
            dimension_semantics=("parallel",)),              # shard window blocks over TCs
    )(x, params["wq"], params["wk"], params["wv"],
      params["bq"], params["bk"], params["bv"],
      params["proj_w"], params["proj_b"], params["rel_pos_bias"])


# -------------------------- init-time param prep ----------------------------

def relative_position_index(patch_size):
    ph, pw = patch_size
    coords = jnp.stack(jnp.meshgrid(jnp.arange(ph), jnp.arange(pw), indexing="ij"))
    coords_flat = coords.reshape(2, -1)                                   # (2, N)
    rel = coords_flat[:, :, None] - coords_flat[:, None, :]               # (2, N, N)
    rel = rel.transpose(1, 2, 0)                                          # (N, N, 2)
    rel = rel.at[:, :, 0].add(ph - 1)
    rel = rel.at[:, :, 1].add(pw - 1)
    rel = rel.at[:, :, 0].multiply(2 * pw - 1)
    return rel.sum(-1)                                                    # (N, N)


def precompute_relative_position_bias(rpb_table, patch_size, num_heads):
    """Hoisted out of forward: pure function of static patch_size + bias table."""
    N = patch_size[0] * patch_size[1]
    idx = relative_position_index(patch_size)
    bias = rpb_table[idx.reshape(-1)]                                     # (N*N, H)
    return bias.reshape(N, N, num_heads).transpose(2, 0, 1)               # (H, N, N)


def init_mha_params(qkv_w, qkv_b, proj_w, proj_b, rpb_table, patch_size, num_heads):
    """One-time transform: split qkv, fold the attention scale into wq/bq, cast
    matmul weights to bf16, precompute the relative-position bias."""
    C = proj_w.shape[0]
    hd = C // num_heads
    scale = hd ** (-0.5)
    return {
        "wq": (qkv_w[:, :C] * scale).astype(jnp.bfloat16),
        "wk": qkv_w[:, C:2 * C].astype(jnp.bfloat16),
        "wv": qkv_w[:, 2 * C:].astype(jnp.bfloat16),
        "bq": (qkv_b[:C] * scale).reshape(1, C).astype(jnp.float32),
        "bk": qkv_b[C:2 * C].reshape(1, C).astype(jnp.float32),
        "bv": qkv_b[2 * C:].reshape(1, C).astype(jnp.float32),
        "proj_w": proj_w.astype(jnp.bfloat16),
        "proj_b": proj_b.reshape(1, C).astype(jnp.float32),
        "rel_pos_bias": precompute_relative_position_bias(
            rpb_table, patch_size, num_heads).astype(jnp.float32),
    }


# ------------------------- pure-JAX f32 reference ---------------------------

def reference_forward(x, qkv_w, qkv_b, proj_w, proj_b, rpb_table, patch_size, num_heads):
    B, N, C = x.shape
    hd = C // num_heads
    scale = hd ** (-0.5)
    qkv = x @ qkv_w + qkv_b
    qkv = qkv.reshape(B, N, 3, num_heads, hd).transpose(2, 0, 3, 1, 4)
    q, k, v = qkv[0] * scale, qkv[1], qkv[2]
    attn = jnp.einsum("bhqd,bhkd->bhqk", q, k)
    idx = relative_position_index(patch_size)
    bias = rpb_table[idx.reshape(-1)].reshape(N, N, num_heads).transpose(2, 0, 1)
    attn = jax.nn.softmax(attn + bias[None], axis=-1)
    out = jnp.einsum("bhqk,bhkd->bhqd", attn, v).transpose(0, 2, 1, 3).reshape(B, N, C)
    return out @ proj_w + proj_b


if __name__ == "__main__":
    # Shapes consistent with the module: dim=32, 4 heads, 4x4 window -> N=16.
    dim = 32
    num_heads = 4
    patch_size = (4, 4)
    B = 8                                   # number of windows
    N = patch_size[0] * patch_size[1]

    key = jax.random.PRNGKey(0)
    k_x, k_qw, k_qb, k_pw, k_pb, k_rpb = jax.random.split(key, 6)

    x = jax.random.normal(k_x, (B, N, dim), dtype=jnp.float32)

    # (in, out) convention; torch's Linear weight would be the transpose.
    qkv_w = jax.random.normal(k_qw, (dim, 3 * dim), dtype=jnp.float32) * 0.1
    qkv_b = jax.random.normal(k_qb, (3 * dim,), dtype=jnp.float32) * 0.1
    proj_w = jax.random.normal(k_pw, (dim, dim), dtype=jnp.float32) * 0.1
    proj_b = jax.random.normal(k_pb, (dim,), dtype=jnp.float32) * 0.1
    rpb_table = jax.random.normal(
        k_rpb, ((2 * patch_size[0] - 1) * (2 * patch_size[1] - 1), num_heads),
        dtype=jnp.float32) * 0.1

    params = init_mha_params(qkv_w, qkv_b, proj_w, proj_b, rpb_table,
                             patch_size, num_heads)

    # block_windows=4 -> grid of 2 steps, exercising the pipelined window batching.
    out = fused_mha(x, params, num_heads=num_heads, block_windows=4)
    out = jax.block_until_ready(out)

    ref = reference_forward(x, qkv_w, qkv_b, proj_w, proj_b, rpb_table,
                            patch_size, num_heads)

    assert out.shape == (B, N, dim)
    # Tolerance covers bf16 MXU operands + approx EUP reciprocal (accumulation is f32).
    max_err = float(jnp.max(jnp.abs(out - ref)))
    ref_scale = float(jnp.max(jnp.abs(ref)))
    assert max_err <= 3e-2 * max(ref_scale, 1e-6), (
        f"mismatch vs reference: max abs err={max_err}, ref scale={ref_scale}")

    print("KERNEL_OK")
</pallas_src>

<mosaic_0001>
module attributes {stable_mosaic.version = 11 : i64} {
  func.func @fused_mha_kernel(%arg0: i32, %arg1: memref<4x16x32xf32, #tpu.memory_space<vmem>>, %arg2: memref<32x32xbf16, #tpu.memory_space<vmem>>, %arg3: memref<32x32xbf16, #tpu.memory_space<vmem>>, %arg4: memref<32x32xbf16, #tpu.memory_space<vmem>>, %arg5: memref<1x32xf32, #tpu.memory_space<vmem>>, %arg6: memref<1x32xf32, #tpu.memory_space<vmem>>, %arg7: memref<1x32xf32, #tpu.memory_space<vmem>>, %arg8: memref<32x32xbf16, #tpu.memory_space<vmem>>, %arg9: memref<1x32xf32, #tpu.memory_space<vmem>>, %arg10: memref<4x16x16xf32, #tpu.memory_space<vmem>>, %arg11: memref<4x16x32xf32, #tpu.memory_space<vmem>>, %arg12: memref<64x32xbf16, #tpu.memory_space<vmem>>) attributes {dimension_semantics = [#tpu.dimension_semantics<parallel>], iteration_bounds = array<i64: 2>, scalar_prefetch = 0 : i64, scratch_operands = 1 : i64, tpu.core_type = #tpu.core_type<tc>, window_params = [{transform_indices = @transform_0, window_bounds = array<i64: 4, 16, 32>}, {pipeline_mode = #tpu.pipeline_mode<synchronous>, transform_indices = @transform_1, window_bounds = array<i64: 32, 32>}, {pipeline_mode = #tpu.pipeline_mode<synchronous>, transform_indices = @transform_2, window_bounds = array<i64: 32, 32>}, {pipeline_mode = #tpu.pipeline_mode<synchronous>, transform_indices = @transform_3, window_bounds = array<i64: 32, 32>}, {pipeline_mode = #tpu.pipeline_mode<synchronous>, transform_indices = @transform_4, window_bounds = array<i64: 1, 32>}, {pipeline_mode = #tpu.pipeline_mode<synchronous>, transform_indices = @transform_5, window_bounds = array<i64: 1, 32>}, {pipeline_mode = #tpu.pipeline_mode<synchronous>, transform_indices = @transform_6, window_bounds = array<i64: 1, 32>}, {pipeline_mode = #tpu.pipeline_mode<synchronous>, transform_indices = @transform_7, window_bounds = array<i64: 32, 32>}, {pipeline_mode = #tpu.pipeline_mode<synchronous>, transform_indices = @transform_8, window_bounds = array<i64: 1, 32>}, {pipeline_mode = #tpu.pipeline_mode<synchronous>, transform_indices = @transform_9, window_bounds = array<i64: 4, 16, 16>}, {transform_indices = @transform_10, window_bounds = array<i64: 4, 16, 32>}]} {
    %c0 = arith.constant 0 : index
    %c0_0 = arith.constant 0 : index
    %c0_1 = arith.constant 0 : index
    %0 = vector.load %arg1[%c0, %c0_0, %c0_1] : memref<4x16x32xf32, #tpu.memory_space<vmem>>, vector<4x16x32xf32>
    %1 = vector.shape_cast %0 : vector<4x16x32xf32> to vector<64x32xf32>
    %2 = arith.truncf %1 : vector<64x32xf32> to vector<64x32xbf16>
    %c0_2 = arith.constant 0 : index
    %c0_3 = arith.constant 0 : index
    %3 = vector.load %arg2[%c0_2, %c0_3] : memref<32x32xbf16, #tpu.memory_space<vmem>>, vector<32x32xbf16>
    %cst = arith.constant dense<0.000000e+00> : vector<64x32xf32>
    %4 = tpu.matmul %2, %3, %cst {dimension_numbers = #tpu.dot_dimension_numbers<[1], [0], [0], [1], [0, 0, 1, 1], [], []>} : vector<64x32xbf16>, vector<32x32xbf16>, vector<64x32xf32> -> vector<64x32xf32>
    %c0_4 = arith.constant 0 : index
    %c0_5 = arith.constant 0 : index
    %5 = vector.load %arg5[%c0_4, %c0_5] : memref<1x32xf32, #tpu.memory_space<vmem>>, vector<1x32xf32>
    %6 = vector.broadcast %5 : vector<1x32xf32> to vector<64x32xf32>
    %7 = arith.addf %4, %6 : vector<64x32xf32>
    %c0_6 = arith.constant 0 : index
    %c0_7 = arith.constant 0 : index
    %8 = vector.load %arg3[%c0_6, %c0_7] : memref<32x32xbf16, #tpu.memory_space<vmem>>, vector<32x32xbf16>
    %cst_8 = arith.constant dense<0.000000e+00> : vector<64x32xf32>
    %9 = tpu.matmul %2, %8, %cst_8 {dimension_numbers = #tpu.dot_dimension_numbers<[1], [0], [0], [1], [0, 0, 1, 1], [], []>} : vector<64x32xbf16>, vector<32x32xbf16>, vector<64x32xf32> -> vector<64x32xf32>
    %c0_9 = arith.constant 0 : index
    %c0_10 = arith.constant 0 : index
    %10 = vector.load %arg6[%c0_9, %c0_10] : memref<1x32xf32, #tpu.memory_space<vmem>>, vector<1x32xf32>
    %11 = vector.broadcast %10 : vector<1x32xf32> to vector<64x32xf32>
    %12 = arith.addf %9, %11 : vector<64x32xf32>
    %c0_11 = arith.constant 0 : index
    %c0_12 = arith.constant 0 : index
    %13 = vector.load %arg4[%c0_11, %c0_12] : memref<32x32xbf16, #tpu.memory_space<vmem>>, vector<32x32xbf16>
    %cst_13 = arith.constant dense<0.000000e+00> : vector<64x32xf32>
    %14 = tpu.matmul %2, %13, %cst_13 {dimension_numbers = #tpu.dot_dimension_numbers<[1], [0], [0], [1], [0, 0, 1, 1], [], []>} : vector<64x32xbf16>, vector<32x32xbf16>, vector<64x32xf32> -> vector<64x32xf32>
    %c0_14 = arith.constant 0 : index
    %c0_15 = arith.constant 0 : index
    %15 = vector.load %arg7[%c0_14, %c0_15] : memref<1x32xf32, #tpu.memory_space<vmem>>, vector<1x32xf32>
    %16 = vector.broadcast %15 : vector<1x32xf32> to vector<64x32xf32>
    %17 = arith.addf %14, %16 : vector<64x32xf32>
    %18 = arith.truncf %7 : vector<64x32xf32> to vector<64x32xbf16>
    %19 = vector.shape_cast %18 : vector<64x32xbf16> to vector<4x16x32xbf16>
    %20 = arith.truncf %12 : vector<64x32xf32> to vector<64x32xbf16>
    %21 = vector.shape_cast %20 : vector<64x32xbf16> to vector<4x16x32xbf16>
    %22 = arith.truncf %17 : vector<64x32xf32> to vector<64x32xbf16>
    %23 = vector.shape_cast %22 : vector<64x32xbf16> to vector<4x16x32xbf16>
    %24 = vector.extract_strided_slice %19 {offsets = [0, 0, 0], sizes = [4, 16, 8], strides = [1, 1, 1]} : vector<4x16x32xbf16> to vector<4x16x8xbf16>
    %25 = vector.extract_strided_slice %21 {offsets = [0, 0, 0], sizes = [4, 16, 8], strides = [1, 1, 1]} : vector<4x16x32xbf16> to vector<4x16x8xbf16>
    %26 = vector.extract_strided_slice %23 {offsets = [0, 0, 0], sizes = [4, 16, 8], strides = [1, 1, 1]} : vector<4x16x32xbf16> to vector<4x16x8xbf16>
    %cst_16 = arith.constant dense<0.000000e+00> : vector<4x16x16xf32>
    %27 = tpu.matmul %24, %25, %cst_16 {dimension_numbers = #tpu.dot_dimension_numbers<[2], [2], [1], [1], [0, 0, 0, 1, 1, 1], [0], [0]>} : vector<4x16x8xbf16>, vector<4x16x8xbf16>, vector<4x16x16xf32> -> vector<4x16x16xf32>
    %c0_17 = arith.constant 0 : index
    %c0_18 = arith.constant 0 : index
    %c0_19 = arith.constant 0 : index
    %28 = vector.load %arg10[%c0_17, %c0_18, %c0_19] : memref<4x16x16xf32, #tpu.memory_space<vmem>>, vector<1x16x16xf32>
    %29 = vector.shape_cast %28 : vector<1x16x16xf32> to vector<16x16xf32>
    %30 = vector.shape_cast %29 : vector<16x16xf32> to vector<1x16x16xf32>
    %31 = vector.broadcast %30 : vector<1x16x16xf32> to vector<4x16x16xf32>
    %32 = arith.addf %27, %31 : vector<4x16x16xf32>
    %cst_20 = arith.constant dense<0xFF800000> : vector<4x16xf32>
    %33 = vector.multi_reduction <maximumf>, %32, %cst_20 [2] : vector<4x16x16xf32> to vector<4x16xf32>
    %34 = vector.shape_cast %33 : vector<4x16xf32> to vector<4x16x1xf32>
    %35 = vector.broadcast %34 : vector<4x16x1xf32> to vector<4x16x16xf32>
    %36 = arith.subf %32, %35 : vector<4x16x16xf32>
    %37 = math.exp %36 : vector<4x16x16xf32>
    %cst_21 = arith.constant dense<0.000000e+00> : vector<4x16xf32>
    %38 = vector.multi_reduction <add>, %37, %cst_21 [2] : vector<4x16x16xf32> to vector<4x16xf32>
    %39 = vector.shape_cast %38 : vector<4x16xf32> to vector<4x16x1xf32>
    %40 = tpu.reciprocal %39 {approx = true} : vector<4x16x1xf32> -> vector<4x16x1xf32>
    %41 = vector.broadcast %40 : vector<4x16x1xf32> to vector<4x16x16xf32>
    %42 = arith.mulf %37, %41 : vector<4x16x16xf32>
    %43 = arith.truncf %42 : vector<4x16x16xf32> to vector<4x16x16xbf16>
    %cst_22 = arith.constant dense<0.000000e+00> : vector<4x16x8xf32>
    %44 = tpu.matmul %43, %26, %cst_22 {dimension_numbers = #tpu.dot_dimension_numbers<[2], [1], [1], [2], [0, 0, 0, 1, 1, 2], [0], [0]>} : vector<4x16x16xbf16>, vector<4x16x8xbf16>, vector<4x16x8xf32> -> vector<4x16x8xf32>
    %45 = vector.shape_cast %44 : vector<4x16x8xf32> to vector<64x8xf32>
    %46 = arith.truncf %45 : vector<64x8xf32> to vector<64x8xbf16>
    %c0_23 = arith.constant 0 : index
    %c0_24 = arith.constant 0 : index
    %47 = vector.load %arg12[%c0_23, %c0_24] : memref<64x32xbf16, #tpu.memory_space<vmem>>, vector<64x8xbf16>
    tpu.vector_store %arg12[%c0_23, %c0_24], %46 {strides = array<i32>} : memref<64x32xbf16, #tpu.memory_space<vmem>>, vector<64x8xbf16>,
    %48 = vector.extract_strided_slice %19 {offsets = [0, 0, 8], sizes = [4, 16, 8], strides = [1, 1, 1]} : vector<4x16x32xbf16> to vector<4x16x8xbf16>
    %49 = vector.extract_strided_slice %21 {offsets = [0, 0, 8], sizes = [4, 16, 8], strides = [1, 1, 1]} : vector<4x16x32xbf16> to vector<4x16x8xbf16>
    %50 = vector.extract_strided_slice %23 {offsets = [0, 0, 8], sizes = [4, 16, 8], strides = [1, 1, 1]} : vector<4x16x32xbf16> to vector<4x16x8xbf16>
    %cst_25 = arith.constant dense<0.000000e+00> : vector<4x16x16xf32>
    %51 = tpu.matmul %48, %49, %cst_25 {dimension_numbers = #tpu.dot_dimension_numbers<[2], [2], [1], [1], [0, 0, 0, 1, 1, 1], [0], [0]>} : vector<4x16x8xbf16>, vector<4x16x8xbf16>, vector<4x16x16xf32> -> vector<4x16x16xf32>
    %c1 = arith.constant 1 : index
    %c0_26 = arith.constant 0 : index
    %c0_27 = arith.constant 0 : index
    %52 = vector.load %arg10[%c1, %c0_26, %c0_27] : memref<4x16x16xf32, #tpu.memory_space<vmem>>, vector<1x16x16xf32>
    %53 = vector.shape_cast %52 : vector<1x16x16xf32> to vector<16x16xf32>
    %54 = vector.shape_cast %53 : vector<16x16xf32> to vector<1x16x16xf32>
    %55 = vector.broadcast %54 : vector<1x16x16xf32> to vector<4x16x16xf32>
    %56 = arith.addf %51, %55 : vector<4x16x16xf32>
    %cst_28 = arith.constant dense<0xFF800000> : vector<4x16xf32>
    %57 = vector.multi_reduction <maximumf>, %56, %cst_28 [2] : vector<4x16x16xf32> to vector<4x16xf32>
    %58 = vector.shape_cast %57 : vector<4x16xf32> to vector<4x16x1xf32>
    %59 = vector.broadcast %58 : vector<4x16x1xf32> to vector<4x16x16xf32>
    %60 = arith.subf %56, %59 : vector<4x16x16xf32>
    %61 = math.exp %60 : vector<4x16x16xf32>
    %cst_29 = arith.constant dense<0.000000e+00> : vector<4x16xf32>
    %62 = vector.multi_reduction <add>, %61, %cst_29 [2] : vector<4x16x16xf32> to vector<4x16xf32>
    %63 = vector.shape_cast %62 : vector<4x16xf32> to vector<4x16x1xf32>
    %64 = tpu.reciprocal %63 {approx = true} : vector<4x16x1xf32> -> vector<4x16x1xf32>
    %65 = vector.broadcast %64 : vector<4x16x1xf32> to vector<4x16x16xf32>
    %66 = arith.mulf %61, %65 : vector<4x16x16xf32>
    %67 = arith.truncf %66 : vector<4x16x16xf32> to vector<4x16x16xbf16>
    %cst_30 = arith.constant dense<0.000000e+00> : vector<4x16x8xf32>
    %68 = tpu.matmul %67, %50, %cst_30 {dimension_numbers = #tpu.dot_dimension_numbers<[2], [1], [1], [2], [0, 0, 0, 1, 1, 2], [0], [0]>} : vector<4x16x16xbf16>, vector<4x16x8xbf16>, vector<4x16x8xf32> -> vector<4x16x8xf32>
    %69 = vector.shape_cast %68 : vector<4x16x8xf32> to vector<64x8xf32>
    %70 = arith.truncf %69 : vector<64x8xf32> to vector<64x8xbf16>
    %c0_31 = arith.constant 0 : index
    %c8 = arith.constant 8 : index
    %71 = vector.load %arg12[%c0_31, %c8] : memref<64x32xbf16, #tpu.memory_space<vmem>>, vector<64x8xbf16>
    tpu.vector_store %arg12[%c0_31, %c8], %70 {strides = array<i32>} : memref<64x32xbf16, #tpu.memory_space<vmem>>, vector<64x8xbf16>,
    %72 = vector.extract_strided_slice %19 {offsets = [0, 0, 16], sizes = [4, 16, 8], strides = [1, 1, 1]} : vector<4x16x32xbf16> to vector<4x16x8xbf16>
    %73 = vector.extract_strided_slice %21 {offsets = [0, 0, 16], sizes = [4, 16, 8], strides = [1, 1, 1]} : vector<4x16x32xbf16> to vector<4x16x8xbf16>
    %74 = vector.extract_strided_slice %23 {offsets = [0, 0, 16], sizes = [4, 16, 8], strides = [1, 1, 1]} : vector<4x16x32xbf16> to vector<4x16x8xbf16>
    %cst_32 = arith.constant dense<0.000000e+00> : vector<4x16x16xf32>
    %75 = tpu.matmul %72, %73, %cst_32 {dimension_numbers = #tpu.dot_dimension_numbers<[2], [2], [1], [1], [0, 0, 0, 1, 1, 1], [0], [0]>} : vector<4x16x8xbf16>, vector<4x16x8xbf16>, vector<4x16x16xf32> -> vector<4x16x16xf32>
    %c2 = arith.constant 2 : index
    %c0_33 = arith.constant 0 : index
    %c0_34 = arith.constant 0 : index
    %76 = vector.load %arg10[%c2, %c0_33, %c0_34] : memref<4x16x16xf32, #tpu.memory_space<vmem>>, vector<1x16x16xf32>
    %77 = vector.shape_cast %76 : vector<1x16x16xf32> to vector<16x16xf32>
    %78 = vector.shape_cast %77 : vector<16x16xf32> to vector<1x16x16xf32>
    %79 = vector.broadcast %78 : vector<1x16x16xf32> to vector<4x16x16xf32>
    %80 = arith.addf %75, %79 : vector<4x16x16xf32>
    %cst_35 = arith.constant dense<0xFF800000> : vector<4x16xf32>
    %81 = vector.multi_reduction <maximumf>, %80, %cst_35 [2] : vector<4x16x16xf32> to vector<4x16xf32>
    %82 = vector.shape_cast %81 : vector<4x16xf32> to vector<4x16x1xf32>
    %83 = vector.broadcast %82 : vector<4x16x1xf32> to vector<4x16x16xf32>
    %84 = arith.subf %80, %83 : vector<4x16x16xf32>
    %85 = math.exp %84 : vector<4x16x16xf32>
    %cst_36 = arith.constant dense<0.000000e+00> : vector<4x16xf32>
    %86 = vector.multi_reduction <add>, %85, %cst_36 [2] : vector<4x16x16xf32> to vector<4x16xf32>
    %87 = vector.shape_cast %86 : vector<4x16xf32> to vector<4x16x1xf32>
    %88 = tpu.reciprocal %87 {approx = true} : vector<4x16x1xf32> -> vector<4x16x1xf32>
    %89 = vector.broadcast %88 : vector<4x16x1xf32> to vector<4x16x16xf32>
    %90 = arith.mulf %85, %89 : vector<4x16x16xf32>
    %91 = arith.truncf %90 : vector<4x16x16xf32> to vector<4x16x16xbf16>
    %cst_37 = arith.constant dense<0.000000e+00> : vector<4x16x8xf32>
    %92 = tpu.matmul %91, %74, %cst_37 {dimension_numbers = #tpu.dot_dimension_numbers<[2], [1], [1], [2], [0, 0, 0, 1, 1, 2], [0], [0]>} : vector<4x16x16xbf16>, vector<4x16x8xbf16>, vector<4x16x8xf32> -> vector<4x16x8xf32>
    %93 = vector.shape_cast %92 : vector<4x16x8xf32> to vector<64x8xf32>
    %94 = arith.truncf %93 : vector<64x8xf32> to vector<64x8xbf16>
    %c0_38 = arith.constant 0 : index
    %c16 = arith.constant 16 : index
    %95 = vector.load %arg12[%c0_38, %c16] : memref<64x32xbf16, #tpu.memory_space<vmem>>, vector<64x8xbf16>
    tpu.vector_store %arg12[%c0_38, %c16], %94 {strides = array<i32>} : memref<64x32xbf16, #tpu.memory_space<vmem>>, vector<64x8xbf16>,
    %96 = vector.extract_strided_slice %19 {offsets = [0, 0, 24], sizes = [4, 16, 8], strides = [1, 1, 1]} : vector<4x16x32xbf16> to vector<4x16x8xbf16>
    %97 = vector.extract_strided_slice %21 {offsets = [0, 0, 24], sizes = [4, 16, 8], strides = [1, 1, 1]} : vector<4x16x32xbf16> to vector<4x16x8xbf16>
    %98 = vector.extract_strided_slice %23 {offsets = [0, 0, 24], sizes = [4, 16, 8], strides = [1, 1, 1]} : vector<4x16x32xbf16> to vector<4x16x8xbf16>
    %cst_39 = arith.constant dense<0.000000e+00> : vector<4x16x16xf32>
    %99 = tpu.matmul %96, %97, %cst_39 {dimension_numbers = #tpu.dot_dimension_numbers<[2], [2], [1], [1], [0, 0, 0, 1, 1, 1], [0], [0]>} : vector<4x16x8xbf16>, vector<4x16x8xbf16>, vector<4x16x16xf32> -> vector<4x16x16xf32>
    %c3 = arith.constant 3 : index
    %c0_40 = arith.constant 0 : index
    %c0_41 = arith.constant 0 : index
    %100 = vector.load %arg10[%c3, %c0_40, %c0_41] : memref<4x16x16xf32, #tpu.memory_space<vmem>>, vector<1x16x16xf32>
    %101 = vector.shape_cast %100 : vector<1x16x16xf32> to vector<16x16xf32>
    %102 = vector.shape_cast %101 : vector<16x16xf32> to vector<1x16x16xf32>
    %103 = vector.broadcast %102 : vector<1x16x16xf32> to vector<4x16x16xf32>
    %104 = arith.addf %99, %103 : vector<4x16x16xf32>
    %cst_42 = arith.constant dense<0xFF800000> : vector<4x16xf32>
    %105 = vector.multi_reduction <maximumf>, %104, %cst_42 [2] : vector<4x16x16xf32> to vector<4x16xf32>
    %106 = vector.shape_cast %105 : vector<4x16xf32> to vector<4x16x1xf32>
    %107 = vector.broadcast %106 : vector<4x16x1xf32> to vector<4x16x16xf32>
    %108 = arith.subf %104, %107 : vector<4x16x16xf32>
    %109 = math.exp %108 : vector<4x16x16xf32>
    %cst_43 = arith.constant dense<0.000000e+00> : vector<4x16xf32>
    %110 = vector.multi_reduction <add>, %109, %cst_43 [2] : vector<4x16x16xf32> to vector<4x16xf32>
    %111 = vector.shape_cast %110 : vector<4x16xf32> to vector<4x16x1xf32>
    %112 = tpu.reciprocal %111 {approx = true} : vector<4x16x1xf32> -> vector<4x16x1xf32>
    %113 = vector.broadcast %112 : vector<4x16x1xf32> to vector<4x16x16xf32>
    %114 = arith.mulf %109, %113 : vector<4x16x16xf32>
    %115 = arith.truncf %114 : vector<4x16x16xf32> to vector<4x16x16xbf16>
    %cst_44 = arith.constant dense<0.000000e+00> : vector<4x16x8xf32>
    %116 = tpu.matmul %115, %98, %cst_44 {dimension_numbers = #tpu.dot_dimension_numbers<[2], [1], [1], [2], [0, 0, 0, 1, 1, 2], [0], [0]>} : vector<4x16x16xbf16>, vector<4x16x8xbf16>, vector<4x16x8xf32> -> vector<4x16x8xf32>
    %117 = vector.shape_cast %116 : vector<4x16x8xf32> to vector<64x8xf32>
    %118 = arith.truncf %117 : vector<64x8xf32> to vector<64x8xbf16>
    %c0_45 = arith.constant 0 : index
    %c24 = arith.constant 24 : index
    %119 = vector.load %arg12[%c0_45, %c24] : memref<64x32xbf16, #tpu.memory_space<vmem>>, vector<64x8xbf16>
    tpu.vector_store %arg12[%c0_45, %c24], %118 {strides = array<i32>} : memref<64x32xbf16, #tpu.memory_space<vmem>>, vector<64x8xbf16>,
    %c0_46 = arith.constant 0 : index
    %c0_47 = arith.constant 0 : index
    %120 = vector.load %arg12[%c0_46, %c0_47] : memref<64x32xbf16, #tpu.memory_space<vmem>>, vector<64x32xbf16>
    %c0_48 = arith.constant 0 : index
    %c0_49 = arith.constant 0 : index
    %121 = vector.load %arg8[%c0_48, %c0_49] : memref<32x32xbf16, #tpu.memory_space<vmem>>, vector<32x32xbf16>
    %cst_50 = arith.constant dense<0.000000e+00> : vector<64x32xf32>
    %122 = tpu.matmul %120, %121, %cst_50 {dimension_numbers = #tpu.dot_dimension_numbers<[1], [0], [0], [1], [0, 0, 1, 1], [], []>} : vector<64x32xbf16>, vector<32x32xbf16>, vector<64x32xf32> -> vector<64x32xf32>
    %c0_51 = arith.constant 0 : index
    %c0_52 = arith.constant 0 : index
    %123 = vector.load %arg9[%c0_51, %c0_52] : memref<1x32xf32, #tpu.memory_space<vmem>>, vector<1x32xf32>
    %124 = vector.broadcast %123 : vector<1x32xf32> to vector<64x32xf32>
    %125 = arith.addf %122, %124 : vector<64x32xf32>
    %126 = vector.shape_cast %125 : vector<64x32xf32> to vector<4x16x32xf32>
    %c0_53 = arith.constant 0 : index
    %c0_54 = arith.constant 0 : index
    %c0_55 = arith.constant 0 : index
    %127 = vector.load %arg11[%c0_53, %c0_54, %c0_55] : memref<4x16x32xf32, #tpu.memory_space<vmem>>, vector<4x16x32xf32>
    tpu.vector_store %arg11[%c0_53, %c0_54, %c0_55], %126 {strides = array<i32>} : memref<4x16x32xf32, #tpu.memory_space<vmem>>, vector<4x16x32xf32>,
    return
  }
  func.func @transform_0(%arg0: i32) -> (i32, i32, i32) {
    %c0_i32 = arith.constant 0 : i32
    %c0_i32_0 = arith.constant 0 : i32
    %c0_i32_1 = arith.constant 0 : i32
    return %arg0, %c0_i32, %c0_i32_0 : i32, i32, i32
  }
  func.func @transform_1(%arg0: i32) -> (i32, i32) {
    %c0_i32 = arith.constant 0 : i32
    %c0_i32_0 = arith.constant 0 : i32
    %c0_i32_1 = arith.constant 0 : i32
    return %c0_i32, %c0_i32_0 : i32, i32
  }
  func.func @transform_2(%arg0: i32) -> (i32, i32) {
    %c0_i32 = arith.constant 0 : i32
    %c0_i32_0 = arith.constant 0 : i32
    %c0_i32_1 = arith.constant 0 : i32
    return %c0_i32, %c0_i32_0 : i32, i32
  }
  func.func @transform_3(%arg0: i32) -> (i32, i32) {
    %c0_i32 = arith.constant 0 : i32
    %c0_i32_0 = arith.constant 0 : i32
    %c0_i32_1 = arith.constant 0 : i32
    return %c0_i32, %c0_i32_0 : i32, i32
  }
  func.func @transform_4(%arg0: i32) -> (i32, i32) {
    %c0_i32 = arith.constant 0 : i32
    %c0_i32_0 = arith.constant 0 : i32
    %c0_i32_1 = arith.constant 0 : i32
    return %c0_i32, %c0_i32_0 : i32, i32
  }
  func.func @transform_5(%arg0: i32) -> (i32, i32) {
    %c0_i32 = arith.constant 0 : i32
    %c0_i32_0 = arith.constant 0 : i32
    %c0_i32_1 = arith.constant 0 : i32
    return %c0_i32, %c0_i32_0 : i32, i32
  }
  func.func @transform_6(%arg0: i32) -> (i32, i32) {
    %c0_i32 = arith.constant 0 : i32
    %c0_i32_0 = arith.constant 0 : i32
    %c0_i32_1 = arith.constant 0 : i32
    return %c0_i32, %c0_i32_0 : i32, i32
  }
  func.func @transform_7(%arg0: i32) -> (i32, i32) {
    %c0_i32 = arith.constant 0 : i32
    %c0_i32_0 = arith.constant 0 : i32
    %c0_i32_1 = arith.constant 0 : i32
    return %c0_i32, %c0_i32_0 : i32, i32
  }
  func.func @transform_8(%arg0: i32) -> (i32, i32) {
    %c0_i32 = arith.constant 0 : i32
    %c0_i32_0 = arith.constant 0 : i32
    %c0_i32_1 = arith.constant 0 : i32
    return %c0_i32, %c0_i32_0 : i32, i32
  }
  func.func @transform_9(%arg0: i32) -> (i32, i32, i32) {
    %c0_i32 = arith.constant 0 : i32
    %c0_i32_0 = arith.constant 0 : i32
    %c0_i32_1 = arith.constant 0 : i32
    %c0_i32_2 = arith.constant 0 : i32
    return %c0_i32, %c0_i32_0, %c0_i32_1 : i32, i32, i32
  }
  func.func @transform_10(%arg0: i32) -> (i32, i32, i32) {
    %c0_i32 = arith.constant 0 : i32
    %c0_i32_0 = arith.constant 0 : i32
    %c0_i32_1 = arith.constant 0 : i32
    return %arg0, %c0_i32, %c0_i32_0 : i32, i32, i32
  }
}

</mosaic_0001>

<bundles_post_ra>
// kernel: tpu_custom_call.1
= control target key start
LH: loop header
LB: loop body
LE: loop exit
PB: predicated region body
PF: predicated region fallthrough
CT: control target
= control target key end

     0   :  { %s3762_s0 = inlined_call_operand.hbm [shape: f32[8,16,32], index: 0, kind: input, shape index: {}]   ;;  %s3763_s1 = inlined_call_operand.hbm [shape: bf16[32,32], index: 1, kind: input, shape index: {}]   ;;  %s3764_s2 = inlined_call_operand.hbm [shape: bf16[32,32], index: 2, kind: input, shape index: {}]   ;;  %s3765_s3 = inlined_call_operand.hbm [shape: bf16[32,32], index: 3, kind: input, shape index: {}]   ;;  %s3766_s4 = inlined_call_operand.vmem [shape: f32[1,32], index: 4, kind: input, shape index: {}]   ;;  %s3767_s5 = inlined_call_operand.vmem [shape: f32[1,32], index: 5, kind: input, shape index: {}]   ;;  %s3768_s6 = inlined_call_operand.vmem [shape: f32[1,32], index: 6, kind: input, shape index: {}]   ;;  %s3769_s7 = inlined_call_operand.hbm [shape: bf16[32,32], index: 7, kind: input, shape index: {}]   ;;  %s3770_s8 = inlined_call_operand.vmem [shape: f32[1,32], index: 8, kind: input, shape index: {}]   ;;  %s3771_s9 = inlined_call_operand.hbm [shape: f32[4,16,16], index: 9, kind: input, shape index: {}]   ;;  %s3772_s10 = inlined_call_operand.hbm [shape: f32[8,16,32], index: 10, kind: output, shape index: {}]  }
   0x1   :  { %3775 = sst [smem:[#allocation20_spill]] %s3763_s1 }
   0x2   :  { %3776 = sst [smem:[#allocation21_spill]] %s3764_s2 }
   0x3   :  { %3777 = sst [smem:[#allocation22_spill]] %s3765_s3 }
   0x4   :  { %3778 = sst [smem:[#allocation23_spill]] %s3769_s7 }
   0x5   :  { %15 = vsyncpa [#allocation4], 0 }
   0x6   :  { %17 = vsyncpa [#allocation4 + $0x1], 0 }
   0x7   :  { %18 = vsyncpa [#allocation7], 0 }
   0x8   :  { %19 = vsyncpa [#allocation10], 0 }
   0x9   :  { %20 = vsyncpa [#allocation13], 0 }
   0xa   :  { %21 = vsyncpa [#allocation5], 0 }
   0xb   :  { %23 = vsyncpa [#allocation5 + $0x1], 0  ;;  %s2994_s13 = smov 0   ;;  %s2996_s14 = smov 0  }
   0xc   :  { %s2998_s15 = smov 0   ;;  %s3000_s16 = smov 0  }
   0xd LB: > { %s3779_s1 = sld [smem:[#allocation20_spill]]  ;;  %s3018_s20 = sadd.s32 4294967295, %s2921_s16   ;;  %s2921_s16 = sphi %s3000_s16, %s3795_s16   ;;  %s2917_s15 = sphi %s2998_s15, %s3794_s15   ;;  %s2913_s14 = sphi %s2996_s14, %s3793_s14   ;;  %s2909_s13 = sphi %s2994_s13, %s3792_s13  }
   0xe   : > { %p2280_p0 = scmp.ge.s32.totalorder %s2921_s16, 1  ;;  %p50_p1 = scmp.eq.s32.totalorder %s3018_s20, 0 }
   0xf   : > { %p275_p2 = scmp.lt.s32.totalorder %s2921_s16, 3  ;;  %s2923_s22 = smov [#allocation6]  }
  0x10   : > { %s288_s23 = sshll.u32 %s2923_s22, 4  ;;  %s3781_s3 = sld [smem:[#allocation22_spill]]  ;;  %s289_s23 = int_to_ptr.vmem [resolvable:$true] %s288_s23 }
  0x11   : > { %p3023_p3 = pnand %p2280_p0, %p275_p2  ;;  %s3783_s2 = sld [smem:[#allocation21_spill]] }
  0x12   : > { %s2924_s11 = smov [#allocation9]   ;;  %s2925_s17 = smov 64  }
  0x13   : > { %s286_s19 = sshll.u32 %s3779_s1, 4  ;;  %p2447_p4 = pneg %p3023_p3  ;;  %s287_s19 = int_to_ptr.hbm [resolvable:$true] %s286_s19 }
  0x14   : > { %s316_s12 = sshll.u32 %s2924_s11, 4  ;;  %s2926_s18 = smov 4   ;;  %s317_s12 = int_to_ptr.vmem [resolvable:$true] %s316_s12 }
  0x15   : > { %p3035_p6 = pnand %p2447_p4, %p50_p1  ;;  %s3784_s7 = sld [smem:[#allocation23_spill]] }
  0x16   : > { %s314_s26 = sshll.u32 %s3781_s3, 4  ;;  %s2927_s1 = smov [#allocation8]   ;;  %s315_s26 = int_to_ptr.hbm [resolvable:$true] %s314_s26 }
  0x17   : > { %s300_s30 = sshll.u32 %s3783_s2, 4  ;;  %s302_s3 = sshll.u32 %s2927_s1, 4  ;;  %s301_s30 = int_to_ptr.hbm [resolvable:$true] %s300_s30  ;;  %s303_s3 = int_to_ptr.vmem [resolvable:$true] %s302_s3 }
  0x18   : > { %2450 = dma.hbm_to_vmem [thread:$0]  (!%p3035_p6), %s287_s19, 256, %s289_s23, [#allocation7], %s2925_s17, %s2925_s17, %s2926_s18  }
  0x19   : > { %2456 = dma.hbm_to_vmem [thread:$0]  (!%p3035_p6), %s315_s26, 256, %s317_s12, [#allocation10], %s2925_s17, %s2925_s17, %s2926_s18  }
  0x1a   : > { %2453 = dma.hbm_to_vmem [thread:$0]  (!%p3035_p6), %s301_s30, 256, %s303_s3, [#allocation7], %s2925_s17, %s2925_s17, %s2926_s18  }
  0x1b   : > { %s337_s25 = sshll.u32 %s3784_s7, 4  ;;  %s2928_s19 = smov [#allocation11]   ;;  %s338_s25 = int_to_ptr.hbm [resolvable:$true] %s337_s25 }
  0x1c   : > { %s339_s23 = sshll.u32 %s2928_s19, 4  ;;  %s354_s29 = sshll.u32 %s3771_s9, 4  ;;  %s340_s23 = int_to_ptr.vmem [resolvable:$true] %s339_s23  ;;  %s355_s29 = int_to_ptr.hbm [resolvable:$true] %s354_s29 }
  0x1d   : > { %2459 = dma.hbm_to_vmem [thread:$0]  (!%p3035_p6), %s338_s25, 256, %s340_s23, [#allocation10], %s2925_s17, %s2925_s17, %s2926_s18  }
  0x1e   : > { %s2929_s1 = smov [#allocation12]   ;;  %s3773_s30 = smov 128  }
  0x1f   : > { %s356_s3 = sshll.u32 %s2929_s1, 4  ;;  %s3774_s11 = smov 8   ;;  %s357_s3 = int_to_ptr.vmem [resolvable:$true] %s356_s3 }
  0x20   : > { %2462 = dma.hbm_to_vmem [thread:$0]  (!%p3035_p6), %s355_s29, 1024, %s357_s3, [#allocation13], %s3773_s30, %s3773_s30, %s3774_s11  }
  0x21   : > { %s2279_s12 = sadd.s32 4294967294, %s2921_s16   ;;  %s3063_s22 = sadd.s32 1, %s2921_s16  }
  0x22   : > { %s36_s24 = sadd.s32 1, %s2917_s15  ;;  %s33_s17 = ssub.s32 %s2921_s16, %s3063_s22 }
  0x23   : > { %p43_p7 = scmp.ne.s32.totalorder %s2917_s15, %s2913_s14  ;;  %p34_p8 = scmp.eq.s32.totalorder %s33_s17, 0 }
  0x24   : > { %p44_p9 = scmp.eq.s32.totalorder %s2921_s16, 0  ;;  %p49_p10 = scmp.ne.s32.totalorder %s2913_s14, %s2909_s13 }
  0x25   : > { %p262_p11 = scmp.eq.s32.totalorder %s3018_s20, 1  ;;  %p268_p0 = scmp.eq.s32.totalorder %s2279_s12, 1 }
  0x26   : > { %s3075_s18 = scalar_select %p34_p8, %s2917_s15, %s36_s24  }
  0x27   : > { %p3079_p12 = por %p50_p1, %p49_p10  ;;  %p3083_p13 = por %p262_p11, %p43_p7 }
  0x28   : > { %p45_p2 = por %p44_p9, %p43_p7  ;;  %s370_s19 = sand.u32 1, %s2917_s15  }
  0x29   : > { %p3088_p4 = por %p268_p0, %p49_p10  ;;  %p2476_p6 = scmp.lt.s32.totalorder %s2921_s16, 2 }
  0x2a   : > { %s2287_s26 = sshll.u32 %s370_s19, 6  ;;  %s2402_s28 = sshll.u32 %s2921_s16, 6 }
  0x2b   : > { %s380_s3 = scalar_lea.hbm %s3762_s0, %s2402_s28  ;;  %s374_s17 = scalar_lea.vmem [#allocation3], %s2287_s26 }
  0x2c   : > { %s381_s24 = sshll.u32 %s380_s3, 4  ;;  %s383_s30 = sshll.u32 %s374_s17, 4  ;;  %s382_s24 = int_to_ptr.hbm [resolvable:$true] %s381_s24  ;;  %s384_s30 = int_to_ptr.vmem [resolvable:$true] %s383_s30 }
  0x2d   : > { %p3097_p8 = pnand %p2476_p6, %p45_p2  ;;  %s371_s11 = scalar_lea.sflag [#allocation4], %s370_s19 }
  0x2e   : > { %s2813_s2 = sshra.s32 %s382_s24, 4  ;;  %s2820_s26 = scalar_lea.hbm %s3762_s0, 128  ;;  %s2814_s2 = int_to_ptr.hbm [resolvable:$true] %s2813_s2 }
  0x2f   : > { %s2815_s7 = scalar_lea.hbm %s2814_s2, 64  ;;  %p2817_p9 = pneg %p3097_p8 }
  0x30   : > { %p2816_p7 = scmp.ne.s32.totalorder %s2814_s2, %s2815_s7  ;;  %p2821_p0 = scmp.lt.s32.totalorder %s2814_s2, %s3762_s0 }
  0x31   : > { %p2822_p2 = scmp.lt.s32.totalorder %s2820_s26, %s2815_s7 }
  0x32   : > { %p2818_p10 = pnand %p2817_p9, %p2816_p7 }
  0x33   : > { %p2823_p6 = por %p2822_p2, %p2821_p0 }
  0x34   : > { %p2819_p11 = pneg %p2818_p10 }
  0x36   : > { %p2824_p5 = pnand %p2823_p6, %p2819_p11 }
  0x38   : > { %2827 = shalt.err (!%p2824_p5)
}
  0x39   : > { %s3789_s19 = smov 8   ;;  %s3790_s17 = smov 128  }
  0x3a   : > { %2466 = dma.hbm_to_vmem [thread:$0]  (!%p3097_p8), %s382_s24, 1024, %s384_s30, %s371_s11, %s3790_s17, %s3790_s17, %s3789_s19  }
  0x3b   : > { %395 = sbr.rel (%p3023_p3) target bundleno = 2416 (0x970), region = 60  ;;  %s3117_s28 = sand.u32 (!%p3023_p3), 1, %s2913_s14  }
  0x3c   : > { %s2292_s2 = sshll.u32 (!%p3023_p3), %s3117_s28, 6  ;;  %s398_s7 = scalar_lea.sflag (!%p3023_p3), [#allocation4], %s3117_s28 }
  0x3d   : > { %s3123_s29 = scalar_lea.vmem (!%p3023_p3), [#allocation3], %s2292_s2 }
  0x40   : > { %2888 = dma.done.wait (%p3079_p12), %s398_s7, 1024  }
  0x41   : > { %2890 = vsyncadd (%p3079_p12), %s398_s7, 4294966272 }
  0x42   : > { %2892 = dma.done.wait (%p50_p1), [#allocation7], 512  }
  0x43   : > { %2894 = vsyncadd (%p50_p1), [#allocation7], 4294966784 }
  0x44   : > { %2896 = dma.done.wait (%p50_p1), [#allocation10], 512  }
  0x45   : > { %2898 = vsyncadd (%p50_p1), [#allocation10], 4294966784 }
  0x46   : > { %2900 = dma.done.wait (%p50_p1), [#allocation13], 1024  }
  0x47   : > { %2902 = vsyncadd (%p50_p1), [#allocation13], 4294966272  ;;  %v2404_v0 = vld [vmem:[#allocation6 + $0x8] sm:$0xff]  ;;  %v2403_v1 = vld [vmem:[#allocation6] sm:$0xff]  ;;  %vm499_vm0 = vcmask 261120   ;;  %vm675_vm1 = vcmask 64512  }
  0x48   : > { %v469_v2 = vld [vmem:[%s3123_s29 + $0x10] sm:$0xff]  ;;  %v470_v3 = vld [vmem:[%s3123_s29 + $0x18] sm:$0xff]  ;;  %2417 = vmatpush.bf16.msra.mxu1 %v2404_v0  ;;  %518 = vmatpush.bf16.msra.mxu0 %v2404_v0  ;;  %v467_v5 = vld [vmem:[%s3123_s29] sm:$0xff]  ;;  %vm786_vm2 = vcmask 130048   ;;  %s2932_s24 = smov 120   ;;  %s2933_s1 = smov 112  }
  0x49   : > { %v2406_v4 = vld [vmem:[#allocation8 + $0x8] sm:$0xff]  ;;  %v468_v6 = vld [vmem:[%s3123_s29 + $0x8] sm:$0xff]  ;;  %2418 = vmatpush.bf16.msra.mxu2 %v2404_v0  ;;  %2419 = vmatpush.bf16.msra.mxu3 %v2404_v0  ;;  %v3145_v7 = vpack.c.bf16 %v470_v3, %v469_v2  ;;  %v2405_v9 = vld [vmem:[#allocation8] sm:$0xff]  ;;  %vm1003_vm3 = vcmask 60416   ;;  %s2934_s3 = smov 104   ;;  %s2935_s19 = smov 8  }
  0x4a   : > { %v3147_v8 = vpack.c.bf16 %v468_v6, %v467_v5  ;;  %v471_v10 = vld [vmem:[%s3123_s29 + $0x20] sm:$0xff]  ;;  %v472_v11 = vld [vmem:[%s3123_s29 + $0x28] sm:$0xff]  ;;  %v473_v13 = vld [vmem:[%s3123_s29 + $0x30] sm:$0xff]  ;;  %s2936_s17 = smov 16   ;;  %vm1347_vm4 = vcmask 126016   ;;  %vm1691_vm5 = vcmask 191616  }
  0x4b   : > { %v3155_v12 = vpack.c.bf16 %v472_v11, %v471_v10  ;;  %v474_v14 = vld [vmem:[%s3123_s29 + $0x38] sm:$0xff]  ;;  %v3176_v20 = vld [vmem:[%s3767_s5] ss:$0 sm:$0xff]  ;;  %v2408_v63 = vld [vmem:[#allocation9 + $0x8] sm:$0xff]  ;;  %s2937_s7 = smov 24   ;;  %vm2035_vm6 = vcmask 257216  }
  0x4c   : > { %2420 = vmatpush.bf16.msra.mxu1 %v2403_v1  ;;  %519 = vmatpush.bf16.msra.mxu0 %v2403_v1  ;;  %v3163_v15 = vpack.c.bf16 %v474_v14, %v473_v13  ;;  %v3182_v24 = vld [vmem:[%s3766_s4] ss:$0 sm:$0xff]  ;;  %s463_s30 = scalar_lea.vmem [#allocation14], %s2292_s2  ;;  %s2416_s2 = sshll.u32 %s3018_s20, 6 }
  0x4d   : > { %2421 = vmatpush.bf16.msra.mxu2 %v2403_v1  ;;  %2422 = vmatpush.bf16.msra.mxu3 %v2403_v1  ;;  %v2407_v3 = vld [vmem:[#allocation9] sm:$0xff]  ;;  %s2155_s12 = sshll.u32 %s463_s30, 4  ;;  %s2863_s29 = scalar_lea.hbm %s3772_s10, 128  ;;  %s2156_s12 = int_to_ptr.vmem [resolvable:$true] %s2155_s12 }
  0x4f   : > { %2308 = vmatmul.msk.bf16.vlgmr.msra.gmra.mxu1 %vm499_vm0, %v3145_v7  ;;  %2307 = vmatmul.msk.bf16.vlgmr.msra.gmra.mxu0 %vm499_vm0, %v3147_v8 }
  0x50   : > { %567 = vmatpush.bf16.msrb.mxu1 %v2406_v4  ;;  %2309 = vmatmul.msk.bf16.vlgmr.msra.gmra.mxu2 %vm499_vm0, %v3155_v12 }
  0x51   : > { %2310 = vmatmul.msk.bf16.vlgmr.msra.gmra.mxu3 %vm499_vm0, %v3163_v15  ;;  %616 = vmatpush.bf16.msrb.mxu2 %v2408_v63  ;;  %v3276_v63 = vld [vmem:[%s3768_s6] ss:$0 sm:$0xff] }
  0x54   : > { %568 = vmatpush.bf16.msrb.mxu1 %v2405_v9 }
  0x55   : > { %617 = vmatpush.bf16.msrb.mxu2 %v2407_v3 }
  0x5f   : > { %2319 = vmatmul.msk.bf16.vlgmr.msrb.gmra.mxu1 %vm499_vm0, %v3147_v8 }
  0x60   : > { %2331 = vmatmul.msk.bf16.vlgmr.msrb.gmra.mxu2 %vm499_vm0, %v3147_v8 }
  0x6f   : > { %2320 = vmatmul.msk.bf16.gmra.mxu1 %vm499_vm0, %v3145_v7 }
  0x70   : > { %2332 = vmatmul.msk.bf16.gmra.mxu2 %vm499_vm0, %v3145_v7  ;;  %v664_v7 = vld [vmem:[#allocation12 + $0x8] sm:$0xff] }
  0x7f   : > { %2321 = vmatmul.msk.bf16.gmra.mxu1 %vm499_vm0, %v3155_v12 }
  0x80   : > { %2333 = vmatmul.msk.bf16.gmra.mxu2 %vm499_vm0, %v3155_v12 }
  0x8f   : > { %2322 = vmatmul.msk.bf16.gmra.mxu1 %vm499_vm0, %v3163_v15 }
  0x90   : > { %2334 = vmatmul.msk.bf16.gmra.mxu2 %vm499_vm0, %v3163_v15 }
  0xcc   : > { %v526_v16 = vpop.f32.mrf.mxu1  ;;  %v521_v18 = vpop.f32.mrf.mxu0 }
  0xcd   : > { %v522_v27 = vadd.f32 %v3182_v24, %v521_v18  ;;  %v527_v46 = vadd.f32 %v3182_v24, %v526_v16 }
  0xcf   : > { %v639_v32 = vpack.c.bf16 %v522_v27, %v522_v27  ;;  %v641_v53 = vpack.c.bf16 %v527_v46, %v527_v46 }
  0xd1   : > { %v667_v37 = vunpack.c.l.b16 %v639_v32  ;;  %v698_v56 = vunpack.c.l.b16 %v641_v53 }
  0xd3   : > { %v531_v49 = vpop.f32.mrf.mxu2 }
  0xd4   : > { %v528_v17 = vpop.f32.mrf.mxu1  ;;  %v523_v22 = vpop.f32.mrf.mxu0  ;;  %v532_v0 = vadd.f32 %v3182_v24, %v531_v49 }
  0xd5   : > { %v524_v28 = vadd.f32 %v3182_v24, %v523_v22  ;;  %v529_v44 = vadd.f32 %v3182_v24, %v528_v17  ;;  %v536_v6 = vpop.f32.mrf.mxu3 }
  0xd6   : > { %v643_v9 = vpack.c.bf16 %v532_v0, %v532_v0 }
  0xd7   : > { %v640_v33 = vpack.c.bf16 %v524_v28, %v524_v28  ;;  %v642_v50 = vpack.c.bf16 %v529_v44, %v529_v44 }
  0xd8   : > { %v728_v16 = vunpack.c.l.b16 %v643_v9 }
  0xd9   : > { %v668_v38 = vunpack.c.l.b16 %v640_v33  ;;  %v699_v55 = vunpack.c.l.b16 %v642_v50 }
  0xdb   : > { %v3192_v40 = vpack.c.b16 %v668_v38, %v667_v37  ;;  %v3204_v58 = vpack.c.b16 %v699_v55, %v698_v56  ;;  %v533_v59 = vpop.f32.mrf.mxu2 }
  0xdc   : > { %v570_v19 = vpop.f32.mrf.mxu1  ;;  %v534_v1 = vadd.f32 %v3182_v24, %v533_v59 }
  0xdd   : > { %v571_v21 = vadd.f32 %v3176_v20, %v570_v19 }
  0xde   : > { %v644_v10 = vpack.c.bf16 %v534_v1, %v534_v1 }
  0xdf   : > { %v647_v25 = vpack.c.bf16 %v571_v21, %v571_v21  ;;  %v538_v21 = vpop.f32.mrf.mxu3 }
  0xe0   : > { %v729_v17 = vunpack.c.l.b16 %v644_v10  ;;  %v539_v27 = vadd.f32 %v3182_v24, %v538_v21 }
  0xe1   : > { %v672_v30 = vunpack.c.l.b16 %v647_v25 }
  0xe2   : > { %v3218_v19 = vpack.c.b16 %v729_v17, %v728_v16 }
  0xe4   : > { %v572_v23 = vpop.f32.mrf.mxu1 }
  0xe5   : > { %v573_v26 = vadd.f32 %v3176_v20, %v572_v23 }
  0xe7   : > { %v648_v29 = vpack.c.bf16 %v573_v26, %v573_v26  ;;  %v537_v26 = vadd.f32 %v3182_v24, %v536_v6  ;;  %v663_v24 = vld [vmem:[#allocation12] sm:$0xff] }
  0xe9   : > { %v673_v31 = vunpack.c.l.b16 %v648_v29 }
  0xeb   : > { %v3187_v34 = vpack.c.b16 %v673_v31, %v672_v30  ;;  %v645_v30 = vpack.c.bf16 %v537_v26, %v537_v26  ;;  %v646_v31 = vpack.c.bf16 %v539_v27, %v539_v27 }
  0xec   : > { %v575_v35 = vpop.f32.mrf.mxu1 }
  0xed   : > { %v680_v36 = vsel %vm675_vm1, %v3187_v34, 0  ;;  %v576_v39 = vadd.f32 %v3176_v20, %v575_v35  ;;  %v759_v35 = vunpack.c.l.b16 %v646_v31 }
  0xee   : > { %689 = vmatpush.bf16.xpose.msrb.mxu3 %v680_v36 }
  0xef   : > { %v649_v42 = vpack.c.bf16 %v576_v39, %v576_v39 }
  0xf1   : > { %v703_v47 = vunpack.c.l.b16 %v649_v42 }
  0xf4   : > { %v577_v41 = vpop.f32.mrf.mxu1 }
  0xf5   : > { %v578_v43 = vadd.f32 %v3176_v20, %v577_v41  ;;  %2335 = vmatmul.msk.bf16.vlgmr.msrb.gmra.mxu3 %vm675_vm1, %v3192_v40 }
  0xf7   : > { %v650_v45 = vpack.c.bf16 %v578_v43, %v578_v43 }
  0xf9   : > { %v704_v48 = vunpack.c.l.b16 %v650_v45 }
  0xfb   : > { %v3199_v51 = vpack.c.b16 %v704_v48, %v703_v47 }
  0xfc   : > { %v580_v52 = vpop.f32.mrf.mxu1 }
  0xfd   : > { %v710_v54 = vsel %vm675_vm1, %v3199_v51, 0  ;;  %v581_v57 = vadd.f32 %v3176_v20, %v580_v52 }
  0xfe   : > { %719 = vmatpush.bf16.xpose.msra.mxu3 %v710_v54 }
  0xff   : > { %v651_v61 = vpack.c.bf16 %v581_v57, %v581_v57 }
 0x101   : > { %v733_v4 = vunpack.c.l.b16 %v651_v61 }
 0x104   : > { %v582_v60 = vpop.f32.mrf.mxu1 }
 0x105   : > { %v583_v62 = vadd.f32 %v3176_v20, %v582_v60  ;;  %2336 = vmatmul.msk.bf16.vlgmr.msra.gmra.mxu3 %vm675_vm1, %v3204_v58 }
 0x107   : > { %v652_v2 = vpack.c.bf16 %v583_v62, %v583_v62  ;;  %v619_v62 = vpop.f32.mrf.mxu2 }
 0x108   : > { %v620_v0 = vadd.f32 %v3276_v63, %v619_v62 }
 0x109   : > { %v734_v5 = vunpack.c.l.b16 %v652_v2 }
 0x10a   : > { %v655_v1 = vpack.c.bf16 %v620_v0, %v620_v0 }
 0x10b   : > { %v3211_v11 = vpack.c.b16 %v734_v5, %v733_v4 }
 0x10c   : > { %v585_v13 = vpop.f32.mrf.mxu1  ;;  %v890_v4 = vunpack.c.l.b16 %v655_v1 }
 0x10d   : > { %v740_v14 = vsel %vm675_vm1, %v3211_v11, 0  ;;  %v586_v18 = vadd.f32 %v3176_v20, %v585_v13 }
 0x10e   : > { %749 = vmatpush.bf16.xpose.msrb.mxu3 %v740_v14 }
 0x10f   : > { %v653_v23 = vpack.c.bf16 %v586_v18, %v586_v18  ;;  %v621_v2 = vpop.f32.mrf.mxu2 }
 0x110   : > { %v622_v3 = vadd.f32 %v3276_v63, %v621_v2 }
 0x111   : > { %v763_v8 = vunpack.c.l.b16 %v653_v23 }
 0x112   : > { %v656_v5 = vpack.c.bf16 %v622_v3, %v622_v3 }
 0x114   : > { %v587_v22 = vpop.f32.mrf.mxu1  ;;  %v891_v6 = vunpack.c.l.b16 %v656_v5 }
 0x115   : > { %v588_v25 = vadd.f32 %v3176_v20, %v587_v22  ;;  %2337 = vmatmul.msk.bf16.vlgmr.msrb.gmra.mxu3 %vm675_vm1, %v3218_v19  ;;  %v758_v20 = vunpack.c.l.b16 %v645_v30 }
 0x116   : > { %v3280_v9 = vpack.c.b16 %v891_v6, %v890_v4 }
 0x117   : > { %v654_v28 = vpack.c.bf16 %v588_v25, %v588_v25  ;;  %v3231_v36 = vpack.c.b16 %v759_v35, %v758_v20  ;;  %v624_v10 = vpop.f32.mrf.mxu2 }
 0x118   : > { %904 = vmatpush.bf16.msrb.mxu0 %v3280_v9  ;;  %v625_v13 = vadd.f32 %v3276_v63, %v624_v10 }
 0x119   : > { %v764_v29 = vunpack.c.l.b16 %v654_v28 }
 0x11a   : > { %v657_v14 = vpack.c.bf16 %v625_v13, %v625_v13 }
 0x11b   : > { %v3225_v32 = vpack.c.b16 %v764_v29, %v763_v8 }
 0x11c   : > { %v918_v21 = vunpack.c.l.b16 %v657_v14 }
 0x11d   : > { %v770_v33 = vsel %vm675_vm1, %v3225_v32, 0 }
 0x11e   : > { %779 = vmatpush.bf16.xpose.msra.mxu3 %v770_v33 }
 0x11f   : > { %v626_v16 = vpop.f32.mrf.mxu2 }
 0x120   : > { %v627_v17 = vadd.f32 %v3276_v63, %v626_v16 }
 0x122   : > { %v658_v22 = vpack.c.bf16 %v627_v17, %v627_v17 }
 0x124   : > { %v919_v25 = vunpack.c.l.b16 %v658_v22 }
 0x125   : > { %2338 = vmatmul.msk.bf16.vlgmr.msra.gmra.mxu3 %vm675_vm1, %v3231_v36 }
 0x126   : > { %v3285_v27 = vpack.c.b16 %v919_v25, %v918_v21 }
 0x128   : > { %932 = vmatpush.bf16.msra.mxu1 %v3285_v27 }
 0x178   : > { %v691_v37 = vpop.f32.mrf.mxu3 }
 0x179   : > { %v692_v38 = vadd.f32 %v691_v37, %v663_v24  ;;  %v629_v37 = vpop.f32.mrf.mxu2 }
 0x17b   : > { %v787_v39 = vsel %vm786_vm2, %v692_v38, -inf }
 0x17c   : > { %788 = vmax.xlane.f32.xlu0 %v787_v39  ;;  %v630_v39 = vadd.f32 %v3276_v63, %v629_v37 }
 0x180   : > { %v693_v41 = vpop.f32.mrf.mxu3 }
 0x181   : > { %v694_v42 = vadd.f32 %v693_v41, %v664_v7 }
 0x183   : > { %v790_v43 = vsel %vm786_vm2, %v694_v42, -inf }
 0x184   : > { %791 = vmax.xlane.f32.xlu0 %v790_v43 }
 0x188   : > { %v721_v44 = vpop.f32.mrf.mxu3 }
 0x189   : > { %v3241_v45 = vadd.f32 %v721_v44, %v663_v24 }
 0x18b   : > { %v793_v12 = vsel %vm786_vm2, %v3241_v45, -inf }
 0x18c   : > { %794 = vmax.xlane.f32.xlu2 %v793_v12  ;;  %v631_v12 = vpop.f32.mrf.mxu2 }
 0x190   : > { %v723_v15 = vpop.f32.mrf.mxu3 }
 0x191   : > { %v3245_v46 = vadd.f32 %v723_v15, %v664_v7  ;;  %v632_v15 = vadd.f32 %v3276_v63, %v631_v12 }
 0x193   : > { %v796_v47 = vsel %vm786_vm2, %v3245_v46, -inf }
 0x194   : > { %797 = vmax.xlane.f32.xlu2 %v796_v47 }
 0x198   : > { %v751_v48 = vpop.f32.mrf.mxu3 }
 0x199   : > { %v3249_v49 = vadd.f32 %v751_v48, %v663_v24  ;;  %v660_v48 = vpack.c.bf16 %v632_v15, %v632_v15 }
 0x19b   : > { %v799_v50 = vsel %vm786_vm2, %v3249_v49, -inf }
 0x19c   : > { %800 = vmax.xlane.f32.xlu1 %v799_v50 }
 0x1a0   : > { %v753_v52 = vpop.f32.mrf.mxu3 }
 0x1a1   : > { %v3253_v53 = vadd.f32 %v753_v52, %v664_v7 }
 0x1a3   : > { %v802_v54 = vsel %vm786_vm2, %v3253_v53, -inf }
 0x1a4   : > { %803 = vmax.xlane.f32.xlu1 %v802_v54  ;;  %v947_v54 = vunpack.c.l.b16 %v660_v48 }
 0x1a8   : > { %v781_v55 = vpop.f32.mrf.mxu3 }
 0x1a9   : > { %v3257_v56 = vadd.f32 %v781_v55, %v663_v24 }
 0x1ab   : > { %v805_v57 = vsel %vm786_vm2, %v3257_v56, -inf }
 0x1ac   : > { %1015 = vrot.lane.b32.xlu2 %v3192_v40, %s2932_s24  ;;  %806 = vmax.xlane.f32.xlu0 %v805_v57 }
 0x1b0   : > { %v783_v59 = vpop.f32.mrf.mxu3 }
 0x1b1   : > { %v3263_v60 = vadd.f32 %v783_v59, %v664_v7 }
 0x1b3   : > { %v808_v61 = vsel %vm786_vm2, %v3263_v60, -inf }
 0x1b4   : > { %809 = vmax.xlane.f32.xlu1 %v808_v61  ;;  %1041 = vrot.lane.b32.xlu2 %v3199_v51, %s2932_s24 }
 0x1c0   : > { %1065 = vrot.lane.b32.xlu0 %v3211_v11, %s2932_s24 }
 0x1cd   : > { %1017 = vrot.lane.b32.xlu1 %v3187_v34, %s2932_s24 }
 0x1ef   : > { %v789_v18 = vpop.xlane.xlu0 %788 }
 0x1f0   : > { %v811_v23 = vsub.f32 %v692_v38, %v789_v18 }
 0x1f2   : > { %v819_v26 = vmul.f32 1.442695, %v811_v23 }
 0x1f4   : > { %2535 = vpow2.f32 %v819_v26 }
 0x1f7   : > { %v792_v28 = vpop.xlane.xlu0 %791 }
 0x1f8   : > { %v812_v8 = vsub.f32 %v694_v42, %v792_v28  ;;  %v659_v42 = vpack.c.bf16 %v630_v39, %v630_v39 }
 0x1fa   : > { %v3288_v29 = vpop.eup %2535  ;;  %v821_v30 = vmul.f32 1.442695, %v812_v8  ;;  %v946_v47 = vunpack.c.l.b16 %v659_v42 }
 0x1fb   : > { %v835_v31 = vsel %vm786_vm2, %v3288_v29, 0.0 }
 0x1fc   : > { %2537 = vpow2.f32 %v821_v30  ;;  %836 = vadd.xlane.f32.xlu2 %v835_v31  ;;  %v3307_v55 = vpack.c.b16 %v947_v54, %v946_v47  ;;  %v634_v30 = vpop.f32.mrf.mxu2 }
 0x1fe   : > { %960 = vmatpush.bf16.msra.mxu2 %v3307_v55 }
 0x1ff   : > { %v795_v33 = vpop.xlane.xlu2 %794 }
 0x200   : > { %v813_v20 = vsub.f32 %v3241_v45, %v795_v33 }
 0x202   : > { %v3293_v35 = vpop.eup %2537  ;;  %v823_v24 = vmul.f32 1.442695, %v813_v20  ;;  %v635_v20 = vadd.f32 %v3276_v63, %v634_v30 }
 0x203   : > { %v838_v38 = vsel %vm786_vm2, %v3293_v35, 0.0 }
 0x204   : > { %2539 = vpow2.f32 %v823_v24  ;;  %839 = vadd.xlane.f32.xlu0 %v838_v38  ;;  %v661_v37 = vpack.c.bf16 %v635_v20, %v635_v20 }
 0x206   : > { %v974_v12 = vunpack.c.l.b16 %v661_v37 }
 0x207   : > { %v798_v7 = vpop.xlane.xlu2 %797 }
 0x208   : > { %v814_v41 = vsub.f32 %v3245_v46, %v798_v7 }
 0x20a   : > { %v3299_v43 = vpop.eup %2539  ;;  %v825_v44 = vmul.f32 1.442695, %v814_v41  ;;  %v636_v41 = vpop.f32.mrf.mxu2 }
 0x20b   : > { %v841_v45 = vsel %vm786_vm2, %v3299_v43, 0.0  ;;  %v637_v42 = vadd.f32 %v3276_v63, %v636_v41 }
 0x20c   : > { %2541 = vpow2.f32 %v825_v44  ;;  %842 = vadd.xlane.f32.xlu0 %v841_v45 }
 0x20d   : > { %v662_v45 = vpack.c.bf16 %v637_v42, %v637_v42  ;;  %v1013_v42 = vld [vmem:[#allocation12 + $0x10] sm:$0xff] }
 0x20f   : > { %v801_v50 = vpop.xlane.xlu1 %800  ;;  %v3304_v52 = vpop.permute.xlu2 %1015  ;;  %v975_v48 = vunpack.c.l.b16 %v662_v45 }
 0x210   : > { %v815_v46 = vsub.f32 %v3249_v49, %v801_v50 }
 0x212   : > { %v3309_v57 = vpop.eup %2541  ;;  %v827_v59 = vmul.f32 1.442695, %v815_v46 }
 0x213   : > { %v844_v61 = vsel %vm786_vm2, %v3309_v57, 0.0 }
 0x214   : > { %2543 = vpow2.f32 %v827_v59  ;;  %845 = vadd.xlane.f32.xlu1 %v844_v61 }
 0x217   : > { %v804_v62 = vpop.xlane.xlu1 %803  ;;  %v1042_v0 = vpop.permute.xlu2 %1041 }
 0x218   : > { %v816_v1 = vsub.f32 %v3253_v53, %v804_v62  ;;  %v1047_v2 = vsel %vm675_vm1, %v1042_v0, 0 }
 0x219   : > { %1056 = vmatpush.bf16.xpose.msrb.mxu1 %v1047_v2 }
 0x21a   : > { %v3316_v49 = vpop.eup %2543  ;;  %v829_v3 = vmul.f32 1.442695, %v816_v1 }
 0x21b   : > { %v847_v4 = vsel %vm786_vm2, %v3316_v49, 0.0 }
 0x21c   : > { %2545 = vpow2.f32 %v829_v3  ;;  %848 = vadd.xlane.f32.xlu1 %v847_v4 }
 0x21f   : > { %v807_v5 = vpop.xlane.xlu0 %806 }
 0x220   : > { %v817_v6 = vsub.f32 %v3257_v56, %v807_v5 }
 0x222   : > { %v3321_v10 = vpop.eup %2545  ;;  %v831_v13 = vmul.f32 1.442695, %v817_v6 }
 0x223   : > { %v850_v53 = vsel %vm786_vm2, %v3321_v10, 0.0 }
 0x224   : > { %2547 = vpow2.f32 %v831_v13  ;;  %851 = vadd.xlane.f32.xlu2 %v850_v53 }
 0x227   : > { %v810_v14 = vpop.xlane.xlu1 %809 }
 0x228   : > { %v818_v16 = vsub.f32 %v3263_v60, %v810_v14 }
 0x22a   : > { %v3326_v17 = vpop.eup %2547  ;;  %v833_v18 = vmul.f32 1.442695, %v818_v16 }
 0x22b   : > { %v853_v21 = vsel %vm786_vm2, %v3326_v17, 0.0 }
 0x22c   : > { %2549 = vpow2.f32 %v833_v18  ;;  %854 = vadd.xlane.f32.xlu2 %v853_v21 }
 0x232   : > { %v3330_v56 = vpop.eup %2549  ;;  %v1066_v22 = vpop.permute.xlu0 %1065 }
 0x233   : > { %v1071_v23 = vsel %vm675_vm1, %v1066_v22, 0  ;;  %v856_v25 = vsel %vm786_vm2, %v3330_v56, 0.0 }
 0x234   : > { %857 = vadd.xlane.f32.xlu0 %v856_v25  ;;  %1080 = vmatpush.bf16.xpose.msrb.mxu2 %v1071_v23 }
 0x235   : > { %1063 = vrot.lane.b32.xlu1 %v3218_v19, %s2932_s24 }
 0x23d   : > { %1087 = vrot.lane.b32.xlu1 %v3231_v36, %s2932_s24 }
 0x23f   : > { %v1018_v60 = vpop.permute.xlu1 %1017 }
 0x240   : > { %v1023_v26 = vsel %vm675_vm1, %v1018_v60, 0 }
 0x241   : > { %1032 = vmatpush.bf16.xpose.msra.mxu0 %v1023_v26 }
 0x244   : > { %1089 = vrot.lane.b32.xlu2 %v3225_v32, %s2932_s24 }
 0x245   : > { %1361 = vrot.lane.b32.xlu1 %v3187_v34, %s2933_s1 }
 0x248   : > { %1039 = vrot.lane.b32.xlu0 %v3204_v58, %s2932_s24 }
 0x24c   : > { %1212 = vrot.lane.b32.xlu2 %v3280_v9, %s2932_s24 }
 0x26f   : > { %v837_v28 = vpop.xlane.xlu2 %836 }
 0x270   : > { %2551 = vrcp.f32 %v837_v28 }
 0x276   : > { %v2552_v31 = vpop.eup %2551 }
 0x277   : > { %v840_v8 = vpop.xlane.xlu0 %839  ;;  %v867_v33 = vmul.f32 %v2552_v31, %v3288_v29  ;;  %v3352_v29 = vpack.c.b16 %v975_v48, %v974_v12  ;;  %v1014_v48 = vld [vmem:[#allocation12 + $0x18] sm:$0xff] }
 0x278   : > { %2553 = vrcp.f32 %v840_v8 }
 0x279   : > { %v875_v38 = vpack.c.bf16 %v867_v33, %v867_v33  ;;  %988 = vmatpush.bf16.msrb.mxu3 %v3352_v29 }
 0x27b   : > { %v885_v15 = vunpack.c.l.b16 %v875_v38 }
 0x27e   : > { %v2554_v24 = vpop.eup %2553 }
 0x27f   : > { %v868_v39 = vmul.f32 %v2554_v24, %v3293_v35  ;;  %v843_v7 = vpop.xlane.xlu0 %842 }
 0x280   : > { %2555 = vrcp.f32 %v843_v7 }
 0x281   : > { %v876_v44 = vpack.c.bf16 %v868_v39, %v868_v39 }
 0x283   : > { %v886_v47 = vunpack.c.l.b16 %v876_v44 }
 0x285   : > { %v887_v50 = vpack.c.b16 %v886_v47, %v885_v15 }
 0x286   : > { %v2556_v46 = vpop.eup %2555 }
 0x287   : > { %v846_v54 = vpop.xlane.xlu1 %845  ;;  %2339 = vmatmul.msk.bf16.vlgmr.msrb.gmra.mxu0 %vm786_vm2, %v887_v50  ;;  %v869_v35 = vmul.f32 %v2556_v46, %v3299_v43 }
 0x288   : > { %2557 = vrcp.f32 %v846_v54 }
 0x289   : > { %v877_v59 = vpack.c.bf16 %v869_v35, %v869_v35 }
 0x28b   : > { %v913_v1 = vunpack.c.l.b16 %v877_v59 }
 0x28e   : > { %v2558_v63 = vpop.eup %2557 }
 0x28f   : > { %v870_v61 = vmul.f32 %v2558_v63, %v3309_v57  ;;  %v849_v62 = vpop.xlane.xlu1 %848 }
 0x290   : > { %2559 = vrcp.f32 %v849_v62 }
 0x291   : > { %v878_v0 = vpack.c.bf16 %v870_v61, %v870_v61 }
 0x293   : > { %v914_v2 = vunpack.c.l.b16 %v878_v0 }
 0x295   : > { %v915_v3 = vpack.c.b16 %v914_v2, %v913_v1 }
 0x296   : > { %v2560_v5 = vpop.eup %2559 }
 0x297   : > { %v852_v4 = vpop.xlane.xlu2 %851  ;;  %2340 = vmatmul.msk.bf16.vlgmr.msra.gmra.mxu1 %vm786_vm2, %v915_v3  ;;  %2343 = vmatmul.msk.bf16.vlgmr.msra.gmra.mxu0 %vm675_vm1, %v3304_v52  ;;  %v871_v43 = vmul.f32 %v2560_v5, %v3316_v49 }
 0x298   : > { %2561 = vrcp.f32 %v852_v4 }
 0x299   : > { %v879_v13 = vpack.c.bf16 %v871_v43, %v871_v43 }
 0x29b   : > { %v941_v16 = vunpack.c.l.b16 %v879_v13 }
 0x29e   : > { %v2562_v6 = vpop.eup %2561 }
 0x29f   : > { %v872_v57 = vmul.f32 %v2562_v6, %v3321_v10  ;;  %v855_v53 = vpop.xlane.xlu2 %854 }
 0x2a0   : > { %2563 = vrcp.f32 %v855_v53 }
 0x2a1   : > { %v880_v14 = vpack.c.bf16 %v872_v57, %v872_v57 }
 0x2a3   : > { %v942_v18 = vunpack.c.l.b16 %v880_v14 }
 0x2a5   : > { %v943_v21 = vpack.c.b16 %v942_v18, %v941_v16 }
 0x2a6   : > { %v2564_v60 = vpop.eup %2563 }
 0x2a7   : > { %v1064_v22 = vpop.permute.xlu1 %1063  ;;  %2341 = vmatmul.msk.bf16.vlgmr.msra.gmra.mxu2 %vm786_vm2, %v943_v21  ;;  %v1090_v23 = vpop.permute.xlu2 %1089  ;;  %v873_v49 = vmul.f32 %v2564_v60, %v3326_v17 }
 0x2a8   : > { %v1095_v52 = vsel %vm675_vm1, %v1090_v23, 0  ;;  %v858_v25 = vpop.xlane.xlu0 %857 }
 0x2a9   : > { %2565 = vrcp.f32 %v858_v25  ;;  %1104 = vmatpush.bf16.xpose.msra.mxu3 %v1095_v52  ;;  %v881_v8 = vpack.c.bf16 %v873_v49, %v873_v49 }
 0x2ab   : > { %v969_v33 = vunpack.c.l.b16 %v881_v8 }
 0x2af   : > { %v2566_v26 = vpop.eup %2565  ;;  %v1088_v10 = vpop.permute.xlu1 %1087 }
 0x2b0   : > { %v1213_v28 = vpop.permute.xlu2 %1212  ;;  %v874_v30 = vmul.f32 %v2566_v26, %v3330_v56 }
 0x2b1   : > { %1225 = vmatpush.bf16.msrb.mxu0 %v1213_v28 }
 0x2b2   : > { %v882_v31 = vpack.c.bf16 %v874_v30, %v874_v30 }
 0x2b4   : > { %v970_v20 = vunpack.c.l.b16 %v882_v31 }
 0x2b6   : > { %v971_v24 = vpack.c.b16 %v970_v20, %v969_v33 }
 0x2b7   : > { %v1362_v37 = vpop.permute.xlu1 %1361  ;;  %2345 = vmatmul.msk.bf16.vlgmr.msrb.gmra.mxu2 %vm675_vm1, %v1064_v22 }
 0x2b8   : > { %v1367_v38 = vsel %vm675_vm1, %v1362_v37, 0  ;;  %2342 = vmatmul.msk.bf16.vlgmr.msrb.gmra.mxu3 %vm786_vm2, %v971_v24 }
 0x2b9   : > { %1376 = vmatpush.bf16.xpose.msra.mxu0 %v1367_v38 }
 0x2ba   : > { %v1040_v17 = vpop.permute.xlu0 %1039 }
 0x2bb   : > { %2344 = vmatmul.msk.bf16.vlgmr.msrb.gmra.mxu1 %vm675_vm1, %v1040_v17 }
 0x2c8   : > { %2346 = vmatmul.msk.bf16.vlgmr.msra.gmra.mxu3 %vm675_vm1, %v1088_v10 }
 0x304   : > { %v906_v39 = vpop.f32.mrf.mxu0 }
 0x305   : > { %v995_v56 = vpack.c.bf16 %v906_v39, %v906_v39 }
 0x307   : > { %1004 = vst.msk [vmem:[#allocation2] sm:$0xf] %vm1003_vm3, %v995_v56 }
 0x30c   : > { %v908_v7 = vpop.f32.mrf.mxu0 }
 0x30d   : > { %v996_v41 = vpack.c.bf16 %v908_v7, %v908_v7 }
 0x30f   : > { %1005 = vst.msk [vmem:[#allocation2 + $0x4] sm:$0xf] %vm1003_vm3, %v996_v41 }
 0x314   : > { %v934_v44 = vpop.f32.mrf.mxu1  ;;  %v1034_v12 = vpop.f32.mrf.mxu0 }
 0x315   : > { %v997_v45 = vpack.c.bf16 %v934_v44, %v934_v44  ;;  %v1035_v15 = vadd.f32 %v1034_v12, %v1013_v42 }
 0x317   : > { %1006 = vst.msk [vmem:[#allocation2 + $0x8] sm:$0xf] %vm1003_vm3, %v997_v45  ;;  %v1111_v47 = vsel %vm786_vm2, %v1035_v15, -inf }
 0x318   : > { %1112 = vmax.xlane.f32.xlu0 %v1111_v47 }
 0x31c   : > { %v936_v50 = vpop.f32.mrf.mxu1  ;;  %v1036_v54 = vpop.f32.mrf.mxu0 }
 0x31d   : > { %v998_v46 = vpack.c.bf16 %v936_v50, %v936_v50  ;;  %v1037_v35 = vadd.f32 %v1036_v54, %v1014_v48 }
 0x31f   : > { %1007 = vst.msk [vmem:[#allocation2 + $0xc] sm:$0xf] %vm1003_vm3, %v998_v46  ;;  %v1114_v63 = vsel %vm786_vm2, %v1037_v35, -inf }
 0x320   : > { %1115 = vmax.xlane.f32.xlu2 %v1114_v63 }
 0x32a   : > { %v962_v59 = vpop.f32.mrf.mxu2 }
 0x32b   : > { %v999_v61 = vpack.c.bf16 %v962_v59, %v962_v59 }
 0x32d   : > { %1008 = vst.msk [vmem:[#allocation2 + $0x10] sm:$0xf] %vm1003_vm3, %v999_v61 }
 0x332   : > { %v964_v62 = vpop.f32.mrf.mxu2 }
 0x333   : > { %v1000_v0 = vpack.c.bf16 %v964_v62, %v964_v62 }
 0x335   : > { %1009 = vst.msk [vmem:[#allocation2 + $0x14] sm:$0xf] %vm1003_vm3, %v1000_v0 }
 0x338   : > { %v1058_v1 = vpop.f32.mrf.mxu1 }
 0x339   : > { %v1059_v2 = vadd.f32 %v1058_v1, %v1013_v42 }
 0x33a   : > { %v1082_v3 = vpop.f32.mrf.mxu2 }
 0x33b   : > { %v990_v4 = vpop.f32.mrf.mxu3  ;;  %v1117_v5 = vsel %vm786_vm2, %v1059_v2, -inf  ;;  %v1083_v22 = vadd.f32 %v1082_v3, %v1013_v42 }
 0x33c   : > { %v1001_v43 = vpack.c.bf16 %v990_v4, %v990_v4  ;;  %1118 = vmax.xlane.f32.xlu2 %v1117_v5 }
 0x33d   : > { %v1123_v52 = vsel %vm786_vm2, %v1083_v22, -inf }
 0x33e   : > { %1010 = vst.msk [vmem:[#allocation2 + $0x18] sm:$0xf] %vm1003_vm3, %v1001_v43 }
 0x340   : > { %v1060_v6 = vpop.f32.mrf.mxu1 }
 0x341   : > { %v1061_v13 = vadd.f32 %v1060_v6, %v1014_v48 }
 0x342   : > { %v1084_v57 = vpop.f32.mrf.mxu2 }
 0x343   : > { %v992_v53 = vpop.f32.mrf.mxu3  ;;  %v1085_v14 = vadd.f32 %v1084_v57, %v1014_v48  ;;  %v1120_v16 = vsel %vm786_vm2, %v1061_v13, -inf }
 0x344   : > { %v1002_v18 = vpack.c.bf16 %v992_v53, %v992_v53  ;;  %1121 = vmax.xlane.f32.xlu1 %v1120_v16 }
 0x345   : > { %v1126_v21 = vsel %vm786_vm2, %v1085_v14, -inf }
 0x346   : > { %1011 = vst.msk [vmem:[#allocation2 + $0x1c] sm:$0xf] %vm1003_vm3, %v1002_v18  ;;  %1127 = vmax.xlane.f32.xlu0 %v1126_v21 }
 0x34b   : > { %v1106_v23 = vpop.f32.mrf.mxu3 }
 0x34c   : > { %v1107_v25 = vadd.f32 %v1106_v23, %v1013_v42  ;;  %1124 = vmax.xlane.f32.xlu1 %v1123_v52 }
 0x34e   : > { %v1129_v60 = vsel %vm786_vm2, %v1107_v25, -inf }
 0x34f   : > { %1130 = vmax.xlane.f32.xlu0 %v1129_v60 }
 0x353   : > { %v1108_v49 = vpop.f32.mrf.mxu3 }
 0x354   : > { %v1109_v26 = vadd.f32 %v1108_v49, %v1014_v48 }
 0x356   : > { %v1132_v10 = vsel %vm786_vm2, %v1109_v26, -inf }
 0x357   : > { %1133 = vmax.xlane.f32.xlu2 %v1132_v10 }
 0x363   : > { %1262 = vrot.lane.b32.xlu0 %v3307_v55, %s2932_s24 }
 0x365   : > { %1359 = vrot.lane.b32.xlu1 %v3192_v40, %s2933_s1 }
 0x36d   : > { %1409 = vrot.lane.b32.xlu1 %v3211_v11, %s2933_s1 }
 0x36f   : > { %1237 = vrot.lane.b32.xlu2 %v3285_v27, %s2932_s24 }
 0x375   : > { %1385 = vrot.lane.b32.xlu1 %v3199_v51, %s2933_s1 }
 0x37d   : > { %1287 = vrot.lane.b32.xlu1 %v3352_v29, %s2932_s24  ;;  %s2154_s24 = scalar_lea.hbm %s3772_s10, %s2416_s2 }
 0x37e   : > { %s2157_s26 = sshll.u32 %s2154_s24, 4  ;;  %s2158_s26 = int_to_ptr.hbm [resolvable:$true] %s2157_s26 }
 0x38b   : > { %v1113_v28 = vpop.xlane.xlu0 %1112 }
 0x38c   : > { %v1135_v31 = vsub.f32 %v1035_v15, %v1113_v28 }
 0x38e   : > { %v1143_v20 = vmul.f32 1.442695, %v1135_v31 }
 0x393   : > { %v1116_v8 = vpop.xlane.xlu2 %1115 }
 0x394   : > { %v1136_v30 = vsub.f32 %v1037_v35, %v1116_v8 }
 0x396   : > { %v1145_v33 = vmul.f32 1.442695, %v1136_v30 }
 0x398   : > { %2567 = vpow2.f32 %v1145_v33 }
 0x399   : > { %2569 = vpow2.f32 %v1143_v20 }
 0x39e   : > { %v3400_v24 = vpop.eup %2567 }
 0x39f   : > { %v1162_v37 = vsel %vm786_vm2, %v3400_v24, 0.0  ;;  %v3404_v38 = vpop.eup %2569 }
 0x3a0   : > { %1163 = vadd.xlane.f32.xlu0 %v1162_v37  ;;  %v1159_v17 = vsel %vm786_vm2, %v3404_v38, 0.0 }
 0x3a7   : > { %1160 = vadd.xlane.f32.xlu1 %v1159_v17 }
 0x3af   : > { %v1119_v39 = vpop.xlane.xlu2 %1118 }
 0x3b0   : > { %v1137_v56 = vsub.f32 %v1059_v2, %v1119_v39 }
 0x3b2   : > { %v1147_v7 = vmul.f32 1.442695, %v1137_v56 }
 0x3b4   : > { %2571 = vpow2.f32 %v1147_v7 }
 0x3b7   : > { %v1122_v41 = vpop.xlane.xlu1 %1121 }
 0x3b8   : > { %v1138_v42 = vsub.f32 %v1061_v13, %v1122_v41 }
 0x3b9   : > { %v1128_v44 = vpop.xlane.xlu0 %1127 }
 0x3ba   : > { %v3408_v12 = vpop.eup %2571  ;;  %v1149_v45 = vmul.f32 1.442695, %v1138_v42  ;;  %v1140_v15 = vsub.f32 %v1085_v14, %v1128_v44 }
 0x3bb   : > { %v1165_v47 = vsel %vm786_vm2, %v3408_v12, 0.0 }
 0x3bc   : > { %2573 = vpow2.f32 %v1149_v45  ;;  %1166 = vadd.xlane.f32.xlu1 %v1165_v47  ;;  %v1153_v48 = vmul.f32 1.442695, %v1140_v15 }
 0x3be   : > { %2575 = vpow2.f32 %v1153_v48 }
 0x3bf   : > { %v1125_v50 = vpop.xlane.xlu1 %1124 }
 0x3c0   : > { %v1139_v54 = vsub.f32 %v1083_v22, %v1125_v50 }
 0x3c2   : > { %v3412_v46 = vpop.eup %2573  ;;  %v1151_v35 = vmul.f32 1.442695, %v1139_v54  ;;  %v1131_v63 = vpop.xlane.xlu0 %1130 }
 0x3c3   : > { %v1141_v59 = vsub.f32 %v1107_v25, %v1131_v63  ;;  %v1168_v61 = vsel %vm786_vm2, %v3412_v46, 0.0 }
 0x3c4   : > { %2577 = vpow2.f32 %v1151_v35  ;;  %1169 = vadd.xlane.f32.xlu0 %v1168_v61  ;;  %v3416_v0 = vpop.eup %2575 }
 0x3c5   : > { %v1155_v62 = vmul.f32 1.442695, %v1141_v59  ;;  %v1174_v5 = vsel %vm786_vm2, %v3416_v0, 0.0 }
 0x3c7   : > { %2579 = vpow2.f32 %v1155_v62 }
 0x3ca   : > { %v3418_v1 = vpop.eup %2577  ;;  %v1134_v2 = vpop.xlane.xlu2 %1133 }
 0x3cb   : > { %v1142_v3 = vsub.f32 %v1109_v26, %v1134_v2  ;;  %v1171_v4 = vsel %vm786_vm2, %v3418_v1, 0.0 }
 0x3cc   : > { %1172 = vadd.xlane.f32.xlu1 %v1171_v4  ;;  %1175 = vadd.xlane.f32.xlu0 %v1174_v5 }
 0x3cd   : > { %v3424_v43 = vpop.eup %2579  ;;  %v1157_v6 = vmul.f32 1.442695, %v1142_v3 }
 0x3ce   : > { %v1177_v13 = vsel %vm786_vm2, %v3424_v43, 0.0 }
 0x3cf   : > { %2581 = vpow2.f32 %v1157_v6  ;;  %1178 = vadd.xlane.f32.xlu2 %v1177_v13 }
 0x3d2   : > { %v1238_v57 = vpop.permute.xlu2 %1237 }
 0x3d3   : > { %1250 = vmatpush.bf16.msra.mxu1 %v1238_v57 }
 0x3d5   : > { %v3428_v53 = vpop.eup %2581  ;;  %v1263_v14 = vpop.permute.xlu0 %1262 }
 0x3d6   : > { %1275 = vmatpush.bf16.msra.mxu2 %v1263_v14  ;;  %v1180_v16 = vsel %vm786_vm2, %v3428_v53, 0.0 }
 0x3d7   : > { %1181 = vadd.xlane.f32.xlu0 %v1180_v16  ;;  %v1360_v18 = vpop.permute.xlu1 %1359 }
 0x3df   : > { %v1410_v21 = vpop.permute.xlu1 %1409 }
 0x3e0   : > { %v1415_v22 = vsel %vm675_vm1, %v1410_v21, 0 }
 0x3e1   : > { %1424 = vmatpush.bf16.xpose.msrb.mxu2 %v1415_v22 }
 0x3e5   : > { %1383 = vrot.lane.b32.xlu1 %v3204_v58, %s2933_s1 }
 0x3e7   : > { %1407 = vrot.lane.b32.xlu2 %v3218_v19, %s2933_s1  ;;  %v1386_v23 = vpop.permute.xlu1 %1385 }
 0x3e8   : > { %v1391_v52 = vsel %vm675_vm1, %v1386_v23, 0 }
 0x3e9   : > { %1400 = vmatpush.bf16.xpose.msrb.mxu1 %v1391_v52 }
 0x3eb   : > { %1433 = vrot.lane.b32.xlu0 %v3225_v32, %s2933_s1 }
 0x3ed   : > { %1431 = vrot.lane.b32.xlu1 %v3231_v36, %s2933_s1 }
 0x3ef   : > { %1556 = vrot.lane.b32.xlu2 %v3280_v9, %s2933_s1  ;;  %v1288_v25 = vpop.permute.xlu1 %1287 }
 0x3f0   : > { %1300 = vmatpush.bf16.msrb.mxu3 %v1288_v25 }
 0x3f5   : > { %1705 = vrot.lane.b32.xlu1 %v3187_v34, %s2934_s3 }
 0x413   : > { %v1164_v60 = vpop.xlane.xlu0 %1163 }
 0x414   : > { %2583 = vrcp.f32 %v1164_v60 }
 0x41a   : > { %v1161_v49 = vpop.xlane.xlu1 %1160  ;;  %v2584_v26 = vpop.eup %2583 }
 0x41b   : > { %2585 = vrcp.f32 %v1161_v49  ;;  %v1192_v10 = vmul.f32 %v2584_v26, %v3400_v24  ;;  %v1357_v49 = vld [vmem:[#allocation12 + $0x20] sm:$0xff] }
 0x41d   : > { %v1200_v8 = vpack.c.bf16 %v1192_v10, %v1192_v10 }
 0x41f   : > { %v1210_v33 = vunpack.c.l.b16 %v1200_v8  ;;  %v1358_v8 = vld [vmem:[#allocation12 + $0x28] sm:$0xff] }
 0x421   : > { %v2586_v28 = vpop.eup %2585 }
 0x422   : > { %v1191_v30 = vmul.f32 %v2586_v28, %v3404_v38 }
 0x424   : > { %v1199_v31 = vpack.c.bf16 %v1191_v30, %v1191_v30 }
 0x426   : > { %v1209_v20 = vunpack.c.l.b16 %v1199_v31 }
 0x428   : > { %v1211_v37 = vpack.c.b16 %v1210_v33, %v1209_v20 }
 0x42a   : > { %2347 = vmatmul.msk.bf16.vlgmr.msrb.gmra.mxu0 %vm786_vm2, %v1211_v37 }
 0x42f   : > { %v1167_v17 = vpop.xlane.xlu1 %1166 }
 0x430   : > { %2587 = vrcp.f32 %v1167_v17 }
 0x436   : > { %v2588_v39 = vpop.eup %2587 }
 0x437   : > { %v1170_v34 = vpop.xlane.xlu0 %1169  ;;  %v1193_v56 = vmul.f32 %v2588_v39, %v3408_v12 }
 0x438   : > { %2589 = vrcp.f32 %v1170_v34 }
 0x439   : > { %v1201_v7 = vpack.c.bf16 %v1193_v56, %v1193_v56 }
 0x43a   : > { %2351 = vmatmul.msk.bf16.vlgmr.msra.gmra.mxu0 %vm675_vm1, %v1360_v18 }
 0x43b   : > { %v1234_v15 = vunpack.c.l.b16 %v1201_v7 }
 0x43e   : > { %v2590_v24 = vpop.eup %2589 }
 0x43f   : > { %v1194_v41 = vmul.f32 %v2590_v24, %v3412_v46  ;;  %v1173_v38 = vpop.xlane.xlu1 %1172  ;;  %v1176_v42 = vpop.xlane.xlu0 %1175 }
 0x440   : > { %2591 = vrcp.f32 %v1173_v38 }
 0x441   : > { %v1202_v44 = vpack.c.bf16 %v1194_v41, %v1194_v41  ;;  %2593 = vrcp.f32 %v1176_v42 }
 0x442   : > { %v1179_v45 = vpop.xlane.xlu2 %1178 }
 0x443   : > { %v1235_v47 = vunpack.c.l.b16 %v1202_v44  ;;  %2595 = vrcp.f32 %v1179_v45 }
 0x445   : > { %v1236_v48 = vpack.c.b16 %v1235_v47, %v1234_v15 }
 0x446   : > { %v2592_v50 = vpop.eup %2591 }
 0x447   : > { %v2594_v54 = vpop.eup %2593  ;;  %v1195_v35 = vmul.f32 %v2592_v50, %v3418_v1  ;;  %2348 = vmatmul.msk.bf16.vlgmr.msra.gmra.mxu1 %vm786_vm2, %v1236_v48 }
 0x448   : > { %v1196_v12 = vmul.f32 %v2594_v54, %v3416_v0 }
 0x449   : > { %v1203_v63 = vpack.c.bf16 %v1195_v35, %v1195_v35  ;;  %v2596_v62 = vpop.eup %2595 }
 0x44a   : > { %v1204_v46 = vpack.c.bf16 %v1196_v12, %v1196_v12  ;;  %v1408_v59 = vpop.permute.xlu2 %1407  ;;  %v1182_v61 = vpop.xlane.xlu0 %1181  ;;  %v1197_v5 = vmul.f32 %v2596_v62, %v3424_v43 }
 0x44b   : > { %v1259_v2 = vunpack.c.l.b16 %v1203_v63  ;;  %2597 = vrcp.f32 %v1182_v61 }
 0x44c   : > { %v1260_v3 = vunpack.c.l.b16 %v1204_v46  ;;  %v1205_v13 = vpack.c.bf16 %v1197_v5, %v1197_v5 }
 0x44e   : > { %v1261_v4 = vpack.c.b16 %v1260_v3, %v1259_v2  ;;  %v1284_v14 = vunpack.c.l.b16 %v1205_v13 }
 0x450   : > { %2349 = vmatmul.msk.bf16.vlgmr.msra.gmra.mxu2 %vm786_vm2, %v1261_v4 }
 0x451   : > { %v2598_v6 = vpop.eup %2597 }
 0x452   : > { %v1198_v1 = vmul.f32 %v2598_v6, %v3428_v53  ;;  %v1557_v57 = vpop.permute.xlu2 %1556 }
 0x453   : > { %1569 = vmatpush.bf16.msrb.mxu0 %v1557_v57 }
 0x454   : > { %v1206_v0 = vpack.c.bf16 %v1198_v1, %v1198_v1 }
 0x456   : > { %v1285_v16 = vunpack.c.l.b16 %v1206_v0 }
 0x457   : > { %v1384_v18 = vpop.permute.xlu1 %1383 }
 0x458   : > { %v1286_v21 = vpack.c.b16 %v1285_v16, %v1284_v14  ;;  %2352 = vmatmul.msk.bf16.vlgmr.msrb.gmra.mxu1 %vm675_vm1, %v1384_v18 }
 0x45a   : > { %2350 = vmatmul.msk.bf16.vlgmr.msrb.gmra.mxu3 %vm786_vm2, %v1286_v21 }
 0x45d   : > { %v1434_v22 = vpop.permute.xlu0 %1433 }
 0x45e   : > { %v1439_v43 = vsel %vm675_vm1, %v1434_v22, 0 }
 0x45f   : > { %1448 = vmatpush.bf16.xpose.msra.mxu3 %v1439_v43  ;;  %v1432_v23 = vpop.permute.xlu1 %1431 }
 0x460   : > { %2353 = vmatmul.msk.bf16.vlgmr.msrb.gmra.mxu2 %vm675_vm1, %v1408_v59 }
 0x467   : > { %v1706_v52 = vpop.permute.xlu1 %1705 }
 0x468   : > { %v1711_v53 = vsel %vm675_vm1, %v1706_v52, 0 }
 0x469   : > { %1720 = vmatpush.bf16.xpose.msra.mxu0 %v1711_v53 }
 0x46a   : > { %2354 = vmatmul.msk.bf16.vlgmr.msra.gmra.mxu3 %vm675_vm1, %v1432_v23 }
 0x4a7   : > { %v3464_v25 = vpop.f32.mrf.mxu0 }
 0x4af   : > { %v3466_v60 = vpop.f32.mrf.mxu0 }
 0x4b7   : > { %v1378_v26 = vpop.f32.mrf.mxu0 }
 0x4b8   : > { %v1379_v10 = vadd.f32 %v1378_v26, %v1357_v49 }
 0x4ba   : > { %v1455_v28 = vsel %vm786_vm2, %v1379_v10, -inf }
 0x4bb   : > { %1456 = vmax.xlane.f32.xlu1 %v1455_v28 }
 0x4bf   : > { %v1380_v30 = vpop.f32.mrf.mxu0 }
 0x4c0   : > { %v1381_v31 = vadd.f32 %v1380_v30, %v1358_v8 }
 0x4c2   : > { %v1458_v33 = vsel %vm786_vm2, %v1381_v31, -inf }
 0x4c3   : > { %1459 = vmax.xlane.f32.xlu2 %v1458_v33 }
 0x4c4   : > { %v3470_v20 = vpop.f32.mrf.mxu1 }
 0x4cc   : > { %v3472_v37 = vpop.f32.mrf.mxu1 }
 0x4d3   : > { %v3474_v17 = vpop.f32.mrf.mxu2 }
 0x4d5   : > { %v1402_v34 = vpop.f32.mrf.mxu1 }
 0x4d6   : > { %v1403_v39 = vadd.f32 %v1402_v34, %v1357_v49 }
 0x4d8   : > { %v1461_v56 = vsel %vm786_vm2, %v1403_v39, -inf }
 0x4d9   : > { %1462 = vmax.xlane.f32.xlu0 %v1461_v56 }
 0x4db   : > { %v3477_v24 = vpop.f32.mrf.mxu2 }
 0x4dd   : > { %v3479_v7 = vpop.f32.mrf.mxu3  ;;  %v1404_v41 = vpop.f32.mrf.mxu1 }
 0x4de   : > { %v1405_v38 = vadd.f32 %v1404_v41, %v1358_v8 }
 0x4e0   : > { %v1464_v42 = vsel %vm786_vm2, %v1405_v38, -inf }
 0x4e1   : > { %1465 = vmax.xlane.f32.xlu1 %v1464_v42 }
 0x4e3   : > { %v1426_v44 = vpop.f32.mrf.mxu2 }
 0x4e4   : > { %v1427_v45 = vadd.f32 %v1426_v44, %v1357_v49 }
 0x4e5   : > { %v3482_v15 = vpop.f32.mrf.mxu3 }
 0x4e6   : > { %v1467_v47 = vsel %vm786_vm2, %v1427_v45, -inf }
 0x4e7   : > { %1468 = vmax.xlane.f32.xlu2 %v1467_v47 }
 0x4eb   : > { %v1428_v48 = vpop.f32.mrf.mxu2 }
 0x4ec   : > { %v1429_v50 = vadd.f32 %v1428_v48, %v1358_v8 }
 0x4ed   : > { %v1450_v54 = vpop.f32.mrf.mxu3 }
 0x4ee   : > { %v1451_v35 = vadd.f32 %v1450_v54, %v1357_v49  ;;  %v1470_v12 = vsel %vm786_vm2, %v1429_v50, -inf }
 0x4ef   : > { %1471 = vmax.xlane.f32.xlu1 %v1470_v12 }
 0x4f0   : > { %v1473_v63 = vsel %vm786_vm2, %v1451_v35, -inf }
 0x4f1   : > { %1474 = vmax.xlane.f32.xlu0 %v1473_v63 }
 0x4f5   : > { %v1452_v46 = vpop.f32.mrf.mxu3 }
 0x4f6   : > { %v3487_v59 = vadd.f32 %v1452_v46, %v1358_v8 }
 0x4f8   : > { %v1476_v61 = vsel %vm786_vm2, %v3487_v59, -inf }
 0x4f9   : > { %1477 = vmax.xlane.f32.xlu2 %v1476_v61 }
 0x511   : > { %1703 = vrot.lane.b32.xlu2 %v3192_v40, %s2934_s3 }
 0x519   : > { %1606 = vrot.lane.b32.xlu2 %v3307_v55, %s2933_s1 }
 0x52e   : > { %v1457_v62 = vpop.xlane.xlu1 %1456 }
 0x52f   : > { %v1479_v2 = vsub.f32 %v1379_v10, %v1457_v62 }
 0x531   : > { %v1487_v3 = vmul.f32 1.442695, %v1479_v2 }
 0x533   : > { %2599 = vpow2.f32 %v1487_v3 }
 0x536   : > { %v1460_v4 = vpop.xlane.xlu2 %1459 }
 0x537   : > { %v1480_v5 = vsub.f32 %v1381_v31, %v1460_v4 }
 0x539   : > { %v3495_v6 = vpop.eup %2599  ;;  %v1489_v13 = vmul.f32 1.442695, %v1480_v5 }
 0x53a   : > { %v1503_v1 = vsel %vm786_vm2, %v3495_v6, 0.0 }
 0x53b   : > { %2601 = vpow2.f32 %v1489_v13  ;;  %1504 = vadd.xlane.f32.xlu1 %v1503_v1 }
 0x541   : > { %v3499_v57 = vpop.eup %2601 }
 0x542   : > { %v1506_v40 = vsel %vm786_vm2, %v3499_v57, 0.0 }
 0x543   : > { %1507 = vadd.xlane.f32.xlu0 %v1506_v40 }
 0x54c   : > { %v1463_v0 = vpop.xlane.xlu0 %1462 }
 0x54d   : > { %v1481_v14 = vsub.f32 %v1403_v39, %v1463_v0 }
 0x54f   : > { %v1491_v16 = vmul.f32 1.442695, %v1481_v14 }
 0x551   : > { %2603 = vpow2.f32 %v1491_v16 }
 0x554   : > { %v1466_v18 = vpop.xlane.xlu1 %1465 }
 0x555   : > { %v1482_v21 = vsub.f32 %v1405_v38, %v1466_v18 }
 0x557   : > { %v3503_v22 = vpop.eup %2603  ;;  %v1493_v43 = vmul.f32 1.442695, %v1482_v21 }
 0x558   : > { %v1509_v23 = vsel %vm786_vm2, %v3503_v22, 0.0 }
 0x559   : > { %2605 = vpow2.f32 %v1493_v43  ;;  %1510 = vadd.xlane.f32.xlu1 %v1509_v23 }
 0x55a   : > { %v1469_v52 = vpop.xlane.xlu2 %1468 }
 0x55b   : > { %v1483_v53 = vsub.f32 %v1427_v45, %v1469_v52 }
 0x55d   : > { %v1495_v49 = vmul.f32 1.442695, %v1483_v53 }
 0x55f   : > { %v3507_v26 = vpop.eup %2605  ;;  %2607 = vpow2.f32 %v1495_v49 }
 0x560   : > { %v1512_v10 = vsel %vm786_vm2, %v3507_v26, 0.0 }
 0x561   : > { %1513 = vadd.xlane.f32.xlu0 %v1512_v10 }
 0x562   : > { %v1472_v28 = vpop.xlane.xlu1 %1471 }
 0x563   : > { %v1484_v8 = vsub.f32 %v1429_v50, %v1472_v28 }
 0x564   : > { %v1475_v30 = vpop.xlane.xlu0 %1474 }
 0x565   : > { %v2608_v31 = vpop.eup %2607  ;;  %v1497_v33 = vmul.f32 1.442695, %v1484_v8  ;;  %v1485_v34 = vsub.f32 %v1451_v35, %v1475_v30 }
 0x566   : > { %v1515_v39 = vsel %vm786_vm2, %v2608_v31, 0.0 }
 0x567   : > { %2609 = vpow2.f32 %v1497_v33  ;;  %v1499_v56 = vmul.f32 1.442695, %v1485_v34  ;;  %1516 = vadd.xlane.f32.xlu1 %v1515_v39 }
 0x569   : > { %2611 = vpow2.f32 %v1499_v56 }
 0x56c   : > { %v1478_v41 = vpop.xlane.xlu2 %1477 }
 0x56d   : > { %v2610_v38 = vpop.eup %2609  ;;  %v1486_v50 = vsub.f32 %v3487_v59, %v1478_v41 }
 0x56e   : > { %v1518_v42 = vsel %vm786_vm2, %v2610_v38, 0.0 }
 0x56f   : > { %v3513_v44 = vpop.eup %2611  ;;  %1519 = vadd.xlane.f32.xlu0 %v1518_v42  ;;  %v1501_v54 = vmul.f32 1.442695, %v1486_v50 }
 0x570   : > { %v1521_v45 = vsel %vm786_vm2, %v3513_v44, 0.0 }
 0x571   : > { %1522 = vadd.xlane.f32.xlu2 %v1521_v45  ;;  %2613 = vpow2.f32 %v1501_v54 }
 0x574   : > { %v1704_v47 = vpop.permute.xlu2 %1703 }
 0x57c   : > { %v1607_v48 = vpop.permute.xlu2 %1606 }
 0x57d   : > { %1619 = vmatpush.bf16.msra.mxu2 %v1607_v48 }
 0x580   : > { %1729 = vrot.lane.b32.xlu1 %v3199_v51, %s2934_s3  ;;  %v3534_v51 = vpop.eup %2613 }
 0x583   : > { %1581 = vrot.lane.b32.xlu0 %v3285_v27, %s2933_s1 }
 0x588   : > { %1753 = vrot.lane.b32.xlu1 %v3211_v11, %s2934_s3  ;;  %v1524_v11 = vsel %vm786_vm2, %v3534_v51, 0.0 }
 0x589   : > { %1777 = vrot.lane.b32.xlu2 %v3225_v32, %s2934_s3 }
 0x590   : > { %1727 = vrot.lane.b32.xlu1 %v3204_v58, %s2934_s3 }
 0x598   : > { %1631 = vrot.lane.b32.xlu1 %v3352_v29, %s2933_s1  ;;  %s2142_s1 = scalar_lea.sflag [#allocation5], %s3117_s28 }
 0x5a0   : > { %1751 = vrot.lane.b32.xlu1 %v3218_v19, %s2934_s3 }
 0x5a8   : > { %1775 = vrot.lane.b32.xlu1 %v3231_v36, %s2934_s3 }
 0x5ad   : > { %1525 = vadd.xlane.f32.xlu0 %v1524_v11 }
 0x5ae   : > { %v1505_v58 = vpop.xlane.xlu1 %1504 }
 0x5af   : > { %2615 = vrcp.f32 %v1505_v58 }
 0x5b5   : > { %v2616_v35 = vpop.eup %2615 }
 0x5b6   : > { %v1508_v32 = vpop.xlane.xlu0 %1507  ;;  %v1535_v12 = vmul.f32 %v2616_v35, %v3495_v6 }
 0x5b7   : > { %2617 = vrcp.f32 %v1508_v32 }
 0x5b8   : > { %v1543_v46 = vpack.c.bf16 %v1535_v12, %v1535_v12 }
 0x5ba   : > { %v1553_v61 = vunpack.c.l.b16 %v1543_v46 }
 0x5bd   : > { %v2618_v63 = vpop.eup %2617 }
 0x5be   : > { %v1536_v19 = vmul.f32 %v2618_v63, %v3499_v57 }
 0x5c0   : > { %v1544_v59 = vpack.c.bf16 %v1536_v19, %v1536_v19 }
 0x5c2   : > { %v1554_v36 = vunpack.c.l.b16 %v1544_v59  ;;  %v1701_v59 = vld [vmem:[#allocation12 + $0x30] sm:$0xff] }
 0x5c4   : > { %v1555_v62 = vpack.c.b16 %v1554_v36, %v1553_v61 }
 0x5c6   : > { %2355 = vmatmul.msk.bf16.vlgmr.msrb.gmra.mxu0 %vm786_vm2, %v1555_v62 }
 0x5cc   : > { %v1511_v2 = vpop.xlane.xlu1 %1510 }
 0x5d4   : > { %v1514_v3 = vpop.xlane.xlu0 %1513 }
 0x5d6   : > { %2359 = vmatmul.msk.bf16.vlgmr.msra.gmra.mxu0 %vm675_vm1, %v1704_v47 }
 0x5da   : > { %v1517_v4 = vpop.xlane.xlu1 %1516 }
 0x5db   : > { %2619 = vrcp.f32 %v1517_v4 }
 0x5dc   : > { %2621 = vrcp.f32 %v1514_v3 }
 0x5e1   : > { %v2620_v13 = vpop.eup %2619 }
 0x5e2   : > { %v1520_v5 = vpop.xlane.xlu0 %1519  ;;  %v1539_v6 = vmul.f32 %v2620_v13, %v2608_v31  ;;  %v2622_v1 = vpop.eup %2621 }
 0x5e3   : > { %2623 = vrcp.f32 %v1520_v5  ;;  %v1538_v16 = vmul.f32 %v2622_v1, %v3507_v26 }
 0x5e4   : > { %2625 = vrcp.f32 %v1511_v2  ;;  %v1547_v0 = vpack.c.bf16 %v1539_v6, %v1539_v6  ;;  %v1523_v34 = vpop.xlane.xlu2 %1522 }
 0x5e5   : > { %v1546_v52 = vpack.c.bf16 %v1538_v16, %v1538_v16  ;;  %2627 = vrcp.f32 %v1523_v34 }
 0x5e6   : > { %v1603_v43 = vunpack.c.l.b16 %v1547_v0 }
 0x5e7   : > { %v1579_v28 = vunpack.c.l.b16 %v1546_v52 }
 0x5e9   : > { %v2624_v57 = vpop.eup %2623 }
 0x5ea   : > { %v2626_v40 = vpop.eup %2625  ;;  %v1540_v14 = vmul.f32 %v2624_v57, %v2610_v38 }
 0x5eb   : > { %v1537_v21 = vmul.f32 %v2626_v40, %v3503_v22  ;;  %v2628_v47 = vpop.eup %2627 }
 0x5ec   : > { %v1548_v18 = vpack.c.bf16 %v1540_v14, %v1540_v14  ;;  %v1778_v56 = vpop.permute.xlu2 %1777  ;;  %v1541_v48 = vmul.f32 %v2628_v47, %v3513_v44 }
 0x5ed   : > { %v1545_v49 = vpack.c.bf16 %v1537_v21, %v1537_v21  ;;  %v1783_v38 = vsel %vm675_vm1, %v1778_v56, 0 }
 0x5ee   : > { %v1604_v23 = vunpack.c.l.b16 %v1548_v18  ;;  %v1549_v54 = vpack.c.bf16 %v1541_v48, %v1541_v48 }
 0x5ef   : > { %v1578_v8 = vunpack.c.l.b16 %v1545_v49 }
 0x5f0   : > { %v1605_v53 = vpack.c.b16 %v1604_v23, %v1603_v43  ;;  %v1628_v32 = vunpack.c.l.b16 %v1549_v54 }
 0x5f1   : > { %v1580_v33 = vpack.c.b16 %v1579_v28, %v1578_v8 }
 0x5f2   : > { %v1730_v10 = vpop.permute.xlu1 %1729  ;;  %2357 = vmatmul.msk.bf16.vlgmr.msra.gmra.mxu2 %vm786_vm2, %v1605_v53 }
 0x5f3   : > { %v1735_v31 = vsel %vm675_vm1, %v1730_v10, 0 }
 0x5f5   : > { %v1582_v30 = vpop.permute.xlu0 %1581 }
 0x5f6   : > { %1594 = vmatpush.bf16.msra.mxu1 %v1582_v30 }
 0x5f9   : > { %2356 = vmatmul.msk.bf16.vlgmr.msra.gmra.mxu1 %vm786_vm2, %v1580_v33 }
 0x5fa   : > { %1744 = vmatpush.bf16.xpose.msrb.mxu1 %v1735_v31  ;;  %v1754_v26 = vpop.permute.xlu1 %1753 }
 0x5fb   : > { %v1759_v22 = vsel %vm675_vm1, %v1754_v26, 0 }
 0x5fc   : > { %1768 = vmatpush.bf16.xpose.msrb.mxu2 %v1759_v22 }
 0x602   : > { %v1728_v39 = vpop.permute.xlu1 %1727 }
 0x609   : > { %2360 = vmatmul.msk.bf16.vlgmr.msrb.gmra.mxu1 %vm675_vm1, %v1728_v39 }
 0x60a   : > { %v1632_v41 = vpop.permute.xlu1 %1631 }
 0x60b   : > { %1644 = vmatpush.bf16.msrb.mxu3 %v1632_v41 }
 0x60f   : > { %1792 = vmatpush.bf16.xpose.msra.mxu3 %v1783_v38 }
 0x612   : > { %v1752_v42 = vpop.permute.xlu1 %1751 }
 0x613   : > { %2361 = vmatmul.msk.bf16.vlgmr.msrb.gmra.mxu2 %vm675_vm1, %v1752_v42 }
 0x61a   : > { %v1776_v63 = vpop.permute.xlu1 %1775 }
 0x620   : > { %v1526_v45 = vpop.xlane.xlu0 %1525 }
 0x621   : > { %2629 = vrcp.f32 %v1526_v45 }
 0x627   : > { %v2630_v50 = vpop.eup %2629 }
 0x628   : > { %v1542_v11 = vmul.f32 %v2630_v50, %v3534_v51  ;;  %v1702_v51 = vld [vmem:[#allocation12 + $0x38] sm:$0xff] }
 0x62a   : > { %v1550_v58 = vpack.c.bf16 %v1542_v11, %v1542_v11 }
 0x62c   : > { %v1629_v35 = vunpack.c.l.b16 %v1550_v58 }
 0x62e   : > { %v1630_v12 = vpack.c.b16 %v1629_v35, %v1628_v32 }
 0x630   : > { %2358 = vmatmul.msk.bf16.vlgmr.msrb.gmra.mxu3 %vm786_vm2, %v1630_v12 }
 0x640   : > { %2362 = vmatmul.msk.bf16.vlgmr.msra.gmra.mxu3 %vm675_vm1, %v1776_v63 }
 0x643   : > { %v3555_v46 = vpop.f32.mrf.mxu0 }
 0x64b   : > { %v3557_v19 = vpop.f32.mrf.mxu0 }
 0x653   : > { %v1722_v61 = vpop.f32.mrf.mxu0 }
 0x654   : > { %v1723_v44 = vadd.f32 %v1722_v61, %v1701_v59 }
 0x656   : > { %v1799_v36 = vsel %vm786_vm2, %v1723_v44, -inf }
 0x657   : > { %1800 = vmax.xlane.f32.xlu0 %v1799_v36 }
 0x65b   : > { %v1724_v62 = vpop.f32.mrf.mxu0 }
 0x65c   : > { %v1725_v2 = vadd.f32 %v1724_v62, %v1702_v51 }
 0x65e   : > { %v1802_v3 = vsel %vm786_vm2, %v1725_v2, -inf }
 0x65f   : > { %1803 = vmax.xlane.f32.xlu1 %v1802_v3  ;;  %v1308_v3 = vpack.c.bf16 %v3466_v60, %v3466_v60 }
 0x675   : > { %v3565_v13 = vpop.f32.mrf.mxu2 }
 0x676   : > { %v3561_v4 = vpop.f32.mrf.mxu1 }
 0x67d   : > { %v3568_v40 = vpop.f32.mrf.mxu2 }
 0x67e   : > { %v3563_v5 = vpop.f32.mrf.mxu1 }
 0x686   : > { %v1746_v6 = vpop.f32.mrf.mxu1 }
 0x687   : > { %v1747_v1 = vadd.f32 %v1746_v6, %v1701_v59 }
 0x689   : > { %v1805_v57 = vsel %vm786_vm2, %v1747_v1, -inf }
 0x68a   : > { %1806 = vmax.xlane.f32.xlu0 %v1805_v57 }
 0x68e   : > { %v1748_v0 = vpop.f32.mrf.mxu1 }
 0x68f   : > { %v1749_v14 = vadd.f32 %v1748_v0, %v1702_v51  ;;  %v1652_v0 = vpack.c.bf16 %v3557_v19, %v3557_v19 }
 0x691   : > { %v1808_v16 = vsel %vm786_vm2, %v1749_v14, -inf }
 0x692   : > { %1809 = vmax.xlane.f32.xlu0 %v1808_v16 }
 0x696   : > { %v1770_v18 = vpop.f32.mrf.mxu2 }
 0x697   : > { %v1771_v21 = vadd.f32 %v1770_v18, %v1701_v59 }
 0x699   : > { %v1811_v43 = vsel %vm786_vm2, %v1771_v21, -inf }
 0x69a   : > { %1812 = vmax.xlane.f32.xlu2 %v1811_v43 }
 0x69e   : > { %v1772_v53 = vpop.f32.mrf.mxu2 }
 0x69f   : > { %v1773_v49 = vadd.f32 %v1772_v53, %v1702_v51 }
 0x6a1   : > { %v1814_v28 = vsel %vm786_vm2, %v1773_v49, -inf }
 0x6a6   : > { %1900 = vrot.lane.b32.xlu0 %v3280_v9, %s2934_s3 }
 0x6b3   : > { %v3574_v23 = vpop.f32.mrf.mxu3 }
 0x6bb   : > { %v3576_v52 = vpop.f32.mrf.mxu3 }
 0x6c3   : > { %v1794_v10 = vpop.f32.mrf.mxu3 }
 0x6c4   : > { %v1795_v30 = vadd.f32 %v1794_v10, %v1701_v59 }
 0x6c6   : > { %v1817_v34 = vsel %vm786_vm2, %v1795_v30, -inf }
 0x6ca   : > { %v1801_v31 = vpop.xlane.xlu0 %1800 }
 0x6cb   : > { %v1823_v22 = vsub.f32 %v1723_v44, %v1801_v31  ;;  %v1796_v9 = vpop.f32.mrf.mxu3 }
 0x6cc   : > { %v1797_v56 = vadd.f32 %v1796_v9, %v1702_v51 }
 0x6cd   : > { %v1831_v39 = vmul.f32 1.442695, %v1823_v22 }
 0x6ce   : > { %v1820_v42 = vsel %vm786_vm2, %v1797_v56, -inf }
 0x6d0   : > { %1815 = vmax.xlane.f32.xlu0 %v1814_v28 }
 0x6d2   : > { %v1804_v8 = vpop.xlane.xlu1 %1803 }
 0x6d3   : > { %v1824_v33 = vsub.f32 %v1725_v2, %v1804_v8  ;;  %v1307_v2 = vpack.c.bf16 %v3464_v25, %v3464_v25 }
 0x6d5   : > { %v1833_v26 = vmul.f32 1.442695, %v1824_v33 }
 0x6d7   : > { %2631 = vpow2.f32 %v1833_v26 }
 0x6d8   : > { %1818 = vmax.xlane.f32.xlu0 %v1817_v34  ;;  %2633 = vpow2.f32 %v1831_v39 }
 0x6dd   : > { %v3580_v41 = vpop.eup %2631 }
 0x6de   : > { %v1850_v38 = vsel %vm786_vm2, %v3580_v41, 0.0  ;;  %v3585_v45 = vpop.eup %2633 }
 0x6df   : > { %1851 = vadd.xlane.f32.xlu1 %v1850_v38  ;;  %v1847_v47 = vsel %vm786_vm2, %v3585_v45, 0.0 }
 0x6e0   : > { %1821 = vmax.xlane.f32.xlu0 %v1820_v42  ;;  %v1651_v42 = vpack.c.bf16 %v3555_v46, %v3555_v46 }
 0x6e8   : > { %1848 = vadd.xlane.f32.xlu0 %v1847_v47  ;;  %v1309_v47 = vpack.c.bf16 %v3470_v20, %v3470_v20 }
 0x6fc   : > { %1950 = vrot.lane.b32.xlu0 %v3307_v55, %s2934_s3 }
 0x6fd   : > { %v1807_v48 = vpop.xlane.xlu0 %1806 }
 0x6fe   : > { %v1825_v50 = vsub.f32 %v1747_v1, %v1807_v48 }
 0x700   : > { %v1835_v54 = vmul.f32 1.442695, %v1825_v50 }
 0x702   : > { %2635 = vpow2.f32 %v1835_v54 }
 0x705   : > { %v1810_v11 = vpop.xlane.xlu0 %1809 }
 0x706   : > { %v1826_v58 = vsub.f32 %v1749_v14, %v1810_v11 }
 0x708   : > { %v3591_v32 = vpop.eup %2635  ;;  %v1837_v35 = vmul.f32 1.442695, %v1826_v58 }
 0x709   : > { %v1853_v12 = vsel %vm786_vm2, %v3591_v32, 0.0 }
 0x70a   : > { %2637 = vpow2.f32 %v1837_v35  ;;  %1854 = vadd.xlane.f32.xlu1 %v1853_v12 }
 0x70d   : > { %v1813_v63 = vpop.xlane.xlu2 %1812 }
 0x70e   : > { %v1827_v59 = vsub.f32 %v1771_v21, %v1813_v63 }
 0x710   : > { %v3595_v61 = vpop.eup %2637  ;;  %v1839_v44 = vmul.f32 1.442695, %v1827_v59 }
 0x711   : > { %v1856_v55 = vsel %vm786_vm2, %v3595_v61, 0.0 }
 0x712   : > { %2639 = vpow2.f32 %v1839_v44  ;;  %1857 = vadd.xlane.f32.xlu2 %v1856_v55 }
 0x718   : > { %v3599_v36 = vpop.eup %2639  ;;  %v1901_v51 = vpop.permute.xlu0 %1900 }
 0x719   : > { %1913 = vmatpush.bf16.msrb.mxu0 %v1901_v51  ;;  %v1859_v62 = vsel %vm786_vm2, %v3599_v36, 0.0 }
 0x71a   : > { %1860 = vadd.xlane.f32.xlu1 %v1859_v62 }
 0x733   : > { %1925 = vrot.lane.b32.xlu1 %v3285_v27, %s2934_s3 }
 0x73b   : > { %1323 = vrot.lane.b32.xlu1 %v1307_v2, %s2935_s19 }
 0x743   : > { %1325 = vrot.lane.b32.xlu1 %v1308_v3, %s2935_s19  ;;  %v1816_v6 = vpop.xlane.xlu0 %1815 }
 0x744   : > { %v1828_v1 = vsub.f32 %v1773_v49, %v1816_v6 }
 0x746   : > { %v1841_v57 = vmul.f32 1.442695, %v1828_v1 }
 0x748   : > { %2641 = vpow2.f32 %v1841_v57 }
 0x74b   : > { %1669 = vrot.lane.b32.xlu1 %v1652_v0, %s2936_s17  ;;  %v1819_v27 = vpop.xlane.xlu0 %1818 }
 0x74c   : > { %v1829_v25 = vsub.f32 %v1795_v30, %v1819_v27 }
 0x74e   : > { %v3614_v14 = vpop.eup %2641  ;;  %v1843_v16 = vmul.f32 1.442695, %v1829_v25 }
 0x74f   : > { %v1862_v60 = vsel %vm786_vm2, %v3614_v14, 0.0 }
 0x750   : > { %2643 = vpow2.f32 %v1843_v16  ;;  %1863 = vadd.xlane.f32.xlu2 %v1862_v60 }
 0x752   : > { %v1852_v18 = vpop.xlane.xlu1 %1851 }
 0x753   : > { %v1822_v21 = vpop.xlane.xlu0 %1821  ;;  %2645 = vrcp.f32 %v1852_v18 }
 0x754   : > { %v1830_v43 = vsub.f32 %v1797_v56, %v1822_v21 }
 0x756   : > { %v3618_v53 = vpop.eup %2643  ;;  %v1845_v19 = vmul.f32 1.442695, %v1830_v43 }
 0x757   : > { %v1865_v49 = vsel %vm786_vm2, %v3618_v53, 0.0 }
 0x758   : > { %2647 = vpow2.f32 %v1845_v19  ;;  %1866 = vadd.xlane.f32.xlu2 %v1865_v49 }
 0x759   : > { %v2646_v28 = vpop.eup %2645 }
 0x75a   : > { %v1880_v30 = vmul.f32 %v2646_v28, %v3580_v41  ;;  %v1310_v41 = vpack.c.bf16 %v3472_v37, %v3472_v37  ;;  %v1313_v37 = vpack.c.bf16 %v3479_v7, %v3479_v7 }
 0x75b   : > { %v1849_v10 = vpop.xlane.xlu0 %1848 }
 0x75c   : > { %2649 = vrcp.f32 %v1849_v10  ;;  %v1888_v26 = vpack.c.bf16 %v1880_v30, %v1880_v30 }
 0x75e   : > { %v3622_v8 = vpop.eup %2647  ;;  %v1898_v9 = vunpack.c.l.b16 %v1888_v26 }
 0x75f   : > { %v1868_v31 = vsel %vm786_vm2, %v3622_v8, 0.0 }
 0x760   : > { %1869 = vadd.xlane.f32.xlu0 %v1868_v31 }
 0x762   : > { %v2650_v33 = vpop.eup %2649 }
 0x763   : > { %v1879_v22 = vmul.f32 %v2650_v33, %v3585_v45  ;;  %v1311_v45 = vpack.c.bf16 %v3474_v17, %v3474_v17  ;;  %v1658_v17 = vpack.c.bf16 %v3576_v52, %v3576_v52 }
 0x765   : > { %v1887_v34 = vpack.c.bf16 %v1879_v22, %v1879_v22  ;;  %v1654_v22 = vpack.c.bf16 %v3563_v5, %v3563_v5  ;;  %v1312_v5 = vpack.c.bf16 %v3477_v24, %v3477_v24 }
 0x767   : > { %v1897_v39 = vunpack.c.l.b16 %v1887_v34 }
 0x769   : > { %v1899_v56 = vpack.c.b16 %v1898_v9, %v1897_v39  ;;  %v1653_v39 = vpack.c.bf16 %v3561_v4, %v3561_v4  ;;  %v1655_v4 = vpack.c.bf16 %v3565_v13, %v3565_v13  ;;  %v1314_v13 = vpack.c.bf16 %v3482_v15, %v3482_v15 }
 0x76b   : > { %2363 = vmatmul.msk.bf16.vlgmr.msrb.gmra.mxu0 %vm786_vm2, %v1899_v56 }
 0x76e   : > { %v1951_v38 = vpop.permute.xlu0 %1950 }
 0x76f   : > { %1963 = vmatpush.bf16.msra.mxu2 %v1951_v38 }
 0x770   : > { %1975 = vrot.lane.b32.xlu2 %v3352_v29, %s2934_s3  ;;  %v1656_v29 = vpack.c.bf16 %v3568_v40, %v3568_v40  ;;  %s2857_s3 = sshra.s32 %s2158_s26, 4  ;;  %s2858_s3 = int_to_ptr.hbm [resolvable:$true] %s2857_s3 }
 0x771   : > { %s2859_s20 = scalar_lea.hbm %s2858_s3, 64  ;;  %p2864_p12 = scmp.lt.s32.totalorder %s2858_s3, %s3772_s10 }
 0x772   : > { %p2860_p1 = scmp.ne.s32.totalorder %s2858_s3, %s2859_s20  ;;  %p2865_p8 = scmp.lt.s32.totalorder %s2863_s29, %s2859_s20 }
 0x774   : > { %1329 = vrot.lane.b32.xlu0 %v1310_v41, %s2935_s19  ;;  %p2861_p3 = pnand %p2860_p1, %p3083_p13  ;;  %p2866_p7 = por %p2865_p8, %p2864_p12 }
 0x776   : > { %p2862_p5 = pneg %p2861_p3 }
 0x778   : > { %1667 = vrot.lane.b32.xlu2 %v1651_v42, %s2936_s17  ;;  %p2867_p9 = pnand %p2866_p7, %p2862_p5 }
 0x77c   : > { %1331 = vrot.lane.b32.xlu0 %v1311_v45, %s2935_s19 }
 0x77d   : > { %v1855_v48 = vpop.xlane.xlu1 %1854 }
 0x780   : > { %1327 = vrot.lane.b32.xlu2 %v1309_v47, %s2935_s19 }
 0x784   : > { %1677 = vrot.lane.b32.xlu0 %v1656_v29, %s2936_s17  ;;  %v2414_v29 = vld [vmem:[#allocation11 + $0x8] sm:$0xff] }
 0x785   : > { %v1858_v46 = vpop.xlane.xlu2 %1857  ;;  %2110 = vmatpush.bf16.msra.mxu0 %v2414_v29 }
 0x786   : > { %2651 = vrcp.f32 %v1858_v46 }
 0x787   : > { %2653 = vrcp.f32 %v1855_v48 }
 0x78c   : > { %1335 = vrot.lane.b32.xlu0 %v1313_v37, %s2935_s19  ;;  %v2652_v20 = vpop.eup %2651  ;;  %v2413_v37 = vld [vmem:[#allocation11] sm:$0xff] }
 0x78d   : > { %v2654_v50 = vpop.eup %2653  ;;  %v1882_v40 = vmul.f32 %v2652_v20, %v3595_v61  ;;  %v1861_v11 = vpop.xlane.xlu1 %1860  ;;  %2111 = vmatpush.bf16.msra.mxu0 %v2413_v37 }
 0x78e   : > { %v1881_v54 = vmul.f32 %v2654_v50, %v3591_v32  ;;  %2655 = vrcp.f32 %v1861_v11 }
 0x78f   : > { %v1890_v58 = vpack.c.bf16 %v1882_v40, %v1882_v40 }
 0x790   : > { %v1889_v7 = vpack.c.bf16 %v1881_v54, %v1881_v54  ;;  %v1657_v54 = vpack.c.bf16 %v3574_v23, %v3574_v23 }
 0x791   : > { %v1923_v35 = vunpack.c.l.b16 %v1890_v58 }
 0x792   : > { %v1922_v12 = vunpack.c.l.b16 %v1889_v7 }
 0x794   : > { %1681 = vrot.lane.b32.xlu0 %v1658_v17, %s2936_s17  ;;  %v1924_v59 = vpack.c.b16 %v1923_v35, %v1922_v12  ;;  %v2656_v55 = vpop.eup %2655 }
 0x795   : > { %v1883_v51 = vmul.f32 %v2656_v55, %v3599_v36 }
 0x797   : > { %v1891_v2 = vpack.c.bf16 %v1883_v51, %v1883_v51 }
 0x799   : > { %v1947_v57 = vunpack.c.l.b16 %v1891_v2 }
 0x7a5   : > { %v1926_v63 = vpop.permute.xlu1 %1925 }
 0x7a6   : > { %1938 = vmatpush.bf16.msra.mxu1 %v1926_v63 }
 0x7a9   : > { %2364 = vmatmul.msk.bf16.vlgmr.msra.gmra.mxu1 %vm786_vm2, %v1924_v59 }
 0x7ad   : > { %v1324_v52 = vpop.permute.xlu1 %1323 }
 0x7ae   : > { %1348 = vst.msk [vmem:[#allocation2] sm:$0xf] %vm1347_vm4, %v1324_v52 }
 0x7b5   : > { %v1326_v44 = vpop.permute.xlu1 %1325 }
 0x7b6   : > { %1349 = vst.msk [vmem:[#allocation2 + $0x4] sm:$0xf] %vm1347_vm4, %v1326_v44 }
 0x7bd   : > { %v1670_v61 = vpop.permute.xlu1 %1669 }
 0x7be   : > { %1693 = vst.msk [vmem:[#allocation2 + $0x4] sm:$0xf] %vm1691_vm5, %v1670_v61 }
 0x7c3   : > { %v1864_v32 = vpop.xlane.xlu2 %1863 }
 0x7c4   : > { %2657 = vrcp.f32 %v1864_v32 }
 0x7ca   : > { %v2658_v62 = vpop.eup %2657 }
 0x7cb   : > { %v1884_v3 = vmul.f32 %v2658_v62, %v3614_v14  ;;  %v1867_v6 = vpop.xlane.xlu2 %1866 }
 0x7cc   : > { %2659 = vrcp.f32 %v1867_v6 }
 0x7cd   : > { %v1892_v1 = vpack.c.bf16 %v1884_v3, %v1884_v3 }
 0x7cf   : > { %v1948_v0 = vunpack.c.l.b16 %v1892_v1  ;;  %v2534_v1 = vld [vmem:[%s3770_s8] ss:$0 sm:$0xff] }
 0x7d1   : > { %v1949_v27 = vpack.c.b16 %v1948_v0, %v1947_v57 }
 0x7d2   : > { %v2660_v60 = vpop.eup %2659 }
 0x7d3   : > { %v1976_v25 = vpop.permute.xlu2 %1975  ;;  %2365 = vmatmul.msk.bf16.vlgmr.msra.gmra.mxu2 %vm786_vm2, %v1949_v27  ;;  %v1870_v16 = vpop.xlane.xlu0 %1869  ;;  %v1885_v18 = vmul.f32 %v2660_v60, %v3618_v53 }
 0x7d4   : > { %2661 = vrcp.f32 %v1870_v16  ;;  %1988 = vmatpush.bf16.msrb.mxu3 %v1976_v25 }
 0x7d5   : > { %v1893_v21 = vpack.c.bf16 %v1885_v18, %v1885_v18 }
 0x7d7   : > { %v1972_v49 = vunpack.c.l.b16 %v1893_v21 }
 0x7da   : > { %v2662_v36 = vpop.eup %2661 }
 0x7db   : > { %v1886_v43 = vmul.f32 %v2662_v36, %v3622_v8  ;;  %v1668_v14 = vpop.permute.xlu2 %1667 }
 0x7dc   : > { %1692 = vst.msk [vmem:[#allocation2] sm:$0xf] %vm1691_vm5, %v1668_v14 }
 0x7dd   : > { %v1894_v19 = vpack.c.bf16 %v1886_v43, %v1886_v43 }
 0x7df   : > { %v1973_v10 = vunpack.c.l.b16 %v1894_v19 }
 0x7e1   : > { %v1974_v28 = vpack.c.b16 %v1973_v10, %v1972_v49 }
 0x7e3   : > { %v1328_v30 = vpop.permute.xlu2 %1327  ;;  %2366 = vmatmul.msk.bf16.vlgmr.msrb.gmra.mxu3 %vm786_vm2, %v1974_v28 }
 0x7e4   : > { %1350 = vst.msk [vmem:[#allocation2 + $0x8] sm:$0xf] %vm1347_vm4, %v1328_v30 }
 0x7e6   : > { %v1330_v31 = vpop.permute.xlu0 %1329 }
 0x7e7   : > { %1351 = vst.msk [vmem:[#allocation2 + $0xc] sm:$0xf] %vm1347_vm4, %v1330_v31 }
 0x7e8   : > { %v1915_v53 = vpop.f32.mrf.mxu0 }
 0x7e9   : > { %v1995_v33 = vpack.c.bf16 %v1915_v53, %v1915_v53 }
 0x7eb   : > { %2011 = vrot.lane.b32.xlu2 %v1995_v33, %s2937_s7 }
 0x7ee   : > { %v1332_v8 = vpop.permute.xlu0 %1331 }
 0x7ef   : > { %1352 = vst.msk [vmem:[#allocation2 + $0x10] sm:$0xf] %vm1347_vm4, %v1332_v8 }
 0x7f0   : > { %v1917_v26 = vpop.f32.mrf.mxu0 }
 0x7f1   : > { %v1996_v34 = vpack.c.bf16 %v1917_v26, %v1917_v26 }
 0x7f3   : > { %1673 = vrot.lane.b32.xlu2 %v1654_v22, %s2936_s17  ;;  %2013 = vrot.lane.b32.xlu1 %v1996_v34, %s2937_s7 }
 0x7f6   : > { %v1678_v9 = vpop.permute.xlu0 %1677 }
 0x7fb   : > { %1671 = vrot.lane.b32.xlu1 %v1653_v39, %s2936_s17 }
 0x7fe   : > { %v1336_v56 = vpop.permute.xlu0 %1335 }
 0x7ff   : > { %1354 = vst.msk [vmem:[#allocation2 + $0x18] sm:$0xf] %vm1347_vm4, %v1336_v56 }
 0x806   : > { %v1682_v62 = vpop.permute.xlu0 %1681 }
 0x826   : > { %v1940_v38 = vpop.f32.mrf.mxu1 }
 0x827   : > { %v1997_v41 = vpack.c.bf16 %v1940_v38, %v1940_v38 }
 0x829   : > { %2015 = vrot.lane.b32.xlu1 %v1997_v41, %s2937_s7 }
 0x82e   : > { %v1942_v42 = vpop.f32.mrf.mxu1 }
 0x82f   : > { %v1998_v45 = vpack.c.bf16 %v1942_v42, %v1942_v42 }
 0x831   : > { %2017 = vrot.lane.b32.xlu2 %v1998_v45, %s2937_s7  ;;  %1333 = vrot.lane.b32.xlu1 %v1312_v5, %s2935_s19 }
 0x839   : > { %1675 = vrot.lane.b32.xlu2 %v1655_v4, %s2936_s17 }
 0x845   : > { %v2012_v47 = vpop.permute.xlu2 %2011 }
 0x846   : > { %2036 = vst.msk [vmem:[#allocation2] sm:$0xf] %vm2035_vm6, %v2012_v47 }
 0x84d   : > { %v1674_v46 = vpop.permute.xlu2 %1673 }
 0x84e   : > { %1695 = vst.msk [vmem:[#allocation2 + $0xc] sm:$0xf] %vm1691_vm5, %v1674_v46 }
 0x856   : > { %v1965_v24 = vpop.f32.mrf.mxu2 }
 0x857   : > { %v1999_v48 = vpack.c.bf16 %v1965_v24, %v1965_v24 }
 0x859   : > { %2019 = vrot.lane.b32.xlu1 %v1999_v48, %s2937_s7 }
 0x85e   : > { %v1967_v17 = vpop.f32.mrf.mxu2 }
 0x85f   : > { %v2000_v20 = vpack.c.bf16 %v1967_v17, %v1967_v17 }
 0x861   : > { %1337 = vrot.lane.b32.xlu1 %v1314_v13, %s2935_s19  ;;  %2021 = vrot.lane.b32.xlu2 %v2000_v20, %s2937_s7 }
 0x865   : > { %v2014_v50 = vpop.permute.xlu1 %2013 }
 0x866   : > { %2037 = vst.msk [vmem:[#allocation2 + $0x4] sm:$0xf] %vm2035_vm6, %v2014_v50  ;;  %v1990_v40 = vpop.f32.mrf.mxu3 }
 0x867   : > { %v2001_v11 = vpack.c.bf16 %v1990_v40, %v1990_v40 }
 0x869   : > { %1679 = vrot.lane.b32.xlu2 %v1657_v54, %s2936_s17  ;;  %2023 = vrot.lane.b32.xlu1 %v2001_v11, %s2937_s7 }
 0x86d   : > { %v1672_v58 = vpop.permute.xlu1 %1671  ;;  %v2409_v7 = vld [vmem:[#allocation2] sm:$0xff] }
 0x86e   : > { %1694 = vst.msk [vmem:[#allocation2 + $0x8] sm:$0xf] %vm1691_vm5, %v1672_v58  ;;  %v1992_v15 = vpop.f32.mrf.mxu3  ;;  %2391 = vmatmul.msk.bf16.vlgmr.msra.gmra.mxu0 %vm499_vm0, %v2409_v7 }
 0x86f   : > { %v2002_v35 = vpack.c.bf16 %v1992_v15, %v1992_v15 }
 0x871   : > { %2025 = vrot.lane.b32.xlu2 %v2002_v35, %s2937_s7 }
 0x88b   : > { %v2018_v12 = vpop.permute.xlu2 %2017 }
 0x88c   : > { %2039 = vst.msk [vmem:[#allocation2 + $0xc] sm:$0xf] %vm2035_vm6, %v2018_v12 }
 0x893   : > { %v1676_v63 = vpop.permute.xlu2 %1675 }
 0x894   : > { %1696 = vst.msk [vmem:[#allocation2 + $0x10] sm:$0xf] %vm1691_vm5, %v1676_v63 }
 0x89b   : > { %v2016_v23 = vpop.permute.xlu1 %2015 }
 0x89c   : > { %2038 = vst.msk [vmem:[#allocation2 + $0x8] sm:$0xf] %vm2035_vm6, %v2016_v23 }
 0x8a3   : > { %v1334_v59 = vpop.permute.xlu1 %1333  ;;  %v2410_v52 = vld [vmem:[#allocation2 + $0x8] sm:$0xff] }
 0x8a4   : > { %1353 = vst.msk [vmem:[#allocation2 + $0x14] sm:$0xf] %vm1347_vm4, %v1334_v59  ;;  %2392 = vmatmul.msk.bf16.gmra.mxu0 %vm499_vm0, %v2410_v52 }
 0x8a5   : > { %1697 = vst.msk [vmem:[#allocation2 + $0x14] sm:$0xf] %vm1691_vm5, %v1678_v9 }
 0x8bb   : > { %v2022_v44 = vpop.permute.xlu2 %2021 }
 0x8bc   : > { %2041 = vst.msk [vmem:[#allocation2 + $0x14] sm:$0xf] %vm2035_vm6, %v2022_v44 }
 0x8c3   : > { %v1680_v61 = vpop.permute.xlu2 %1679 }
 0x8c4   : > { %1698 = vst.msk [vmem:[#allocation2 + $0x18] sm:$0xf] %vm1691_vm5, %v1680_v61 }
 0x8cb   : > { %v2020_v32 = vpop.permute.xlu1 %2019  ;;  %v2026_v2 = vpop.permute.xlu2 %2025 }
 0x8cc   : > { %2040 = vst.msk [vmem:[#allocation2 + $0x10] sm:$0xf] %vm2035_vm6, %v2020_v32 }
 0x8d3   : > { %v1338_v55 = vpop.permute.xlu1 %1337  ;;  %v2411_v51 = vld [vmem:[#allocation2 + $0x10] sm:$0xff] }
 0x8d4   : > { %1355 = vst.msk [vmem:[#allocation2 + $0x1c] sm:$0xf] %vm1347_vm4, %v1338_v55  ;;  %2393 = vmatmul.msk.bf16.gmra.mxu0 %vm499_vm0, %v2411_v51 }
 0x8d5   : > { %1699 = vst.msk [vmem:[#allocation2 + $0x1c] sm:$0xf] %vm1691_vm5, %v1682_v62 }
 0x8d6   : > { %2043 = vst.msk [vmem:[#allocation2 + $0x1c] sm:$0xf] %vm2035_vm6, %v2026_v2 }
 0x8db   : > { %v2024_v3 = vpop.permute.xlu1 %2023 }
 0x8dc   : > { %2042 = vst.msk [vmem:[#allocation2 + $0x18] sm:$0xf] %vm2035_vm6, %v2024_v3 }
 0x8e3   : > { %v2412_v6 = vld [vmem:[#allocation2 + $0x18] sm:$0xff] }
 0x8e4   : > { %2394 = vmatmul.msk.bf16.gmra.mxu0 %vm499_vm0, %v2412_v6 }
 0x8eb   : > { %v2113_v57 = vpop.f32.mrf.mxu0 }
 0x8ec   : > { %v2114_v0 = vadd.f32 %v2534_v1, %v2113_v57 }
 0x8ee   : > { %2133 = vst.msk [vmem:[%s463_s30] sm:$0xff] %vm499_vm0, %v2114_v0 }
 0x8f3   : > { %v2115_v27 = vpop.f32.mrf.mxu0 }
 0x8f4   : > { %v2116_v25 = vadd.f32 %v2534_v1, %v2115_v27 }
 0x8f6   : > { %2134 = vst.msk [vmem:[%s463_s30 + $0x8] sm:$0xff] %vm499_vm0, %v2116_v25 }
 0x921   : > { %v2118_v16 = vpop.f32.mrf.mxu0 }
 0x922   : > { %v2119_v60 = vadd.f32 %v2534_v1, %v2118_v16 }
 0x924   : > { %2135 = vst.msk [vmem:[%s463_s30 + $0x10] sm:$0xff] %vm499_vm0, %v2119_v60 }
 0x929   : > { %v2120_v18 = vpop.f32.mrf.mxu0 }
 0x92a   : > { %v2121_v36 = vadd.f32 %v2534_v1, %v2120_v18 }
 0x92c   : > { %2136 = vst.msk [vmem:[%s463_s30 + $0x18] sm:$0xff] %vm499_vm0, %v2121_v36 }
 0x951   : > { %v2123_v21 = vpop.f32.mrf.mxu0 }
 0x952   : > { %v2124_v43 = vadd.f32 %v2534_v1, %v2123_v21 }
 0x954   : > { %2137 = vst.msk [vmem:[%s463_s30 + $0x20] sm:$0xff] %vm499_vm0, %v2124_v43 }
 0x959   : > { %v2125_v14 = vpop.f32.mrf.mxu0 }
 0x95a   : > { %v2126_v19 = vadd.f32 %v2534_v1, %v2125_v14 }
 0x95c   : > { %2138 = vst.msk [vmem:[%s463_s30 + $0x28] sm:$0xff] %vm499_vm0, %v2126_v19 }
 0x961   : > { %v2128_v49 = vpop.f32.mrf.mxu0 }
 0x962   : > { %v2129_v10 = vadd.f32 %v2534_v1, %v2128_v49 }
 0x964   : > { %2139 = vst.msk [vmem:[%s463_s30 + $0x30] sm:$0xff] %vm499_vm0, %v2129_v10 }
 0x969   : > { %v2130_v28 = vpop.f32.mrf.mxu0 }
 0x96a   : > { %v2131_v30 = vadd.f32 %v2534_v1, %v2130_v28 }
 0x96c   : > { %2140 = vst.msk [vmem:[%s463_s30 + $0x38] sm:$0xff] %vm499_vm0, %v2131_v30 }
 0x96d   : > { %2870 = shalt.err (!%p2867_p9)
}
 0x96e   : > { %s2938_s28 = smov 128  }
 0x96f   : > { %2445 = dma.vmem_to_hbm [thread:$0]  (%p3083_p13), %s2156_s12, 1024, %s2158_s26, %s2142_s1, %s2938_s28, %s2938_s28, %s2935_s19  }
 0x970 PF: > { %s2172_s30 = sand.u32 1, %s2909_s13   ;;  %p3791_p10 = scmp.ge.s32.totalorder %s2921_s16, 2 }
 0x971   : > { %s2173_s11 = scalar_lea.sflag [#allocation5], %s2172_s30 }
 0x972   : > { %p2468_p11 = pnand %p3791_p10, %p3088_p4 }
 0x974   : > { %p2469_p0 = pneg %p2468_p11 }
 0x976   : > { %2904 = dma.done.wait (%p2469_p0), %s2173_s11, 1024  }
 0x977   : > { %2906 = vsyncadd (%p2469_p0), %s2173_s11, 4294966272  ;;  %p26_p2 = scmp.ge.s32.totalorder %s3063_s22, 4   ;;  %s3792_s13 = smov %s2913_s14 }
 0x978   : > { %s3793_s14 = smov %s2917_s15  ;;  %s3794_s15 = smov %s3075_s18 }
 0x979   : > { %s3795_s16 = smov %s3063_s22  ;;  %28 = sbr.rel (!%p26_p2) target bundleno = 13 (0xd), region = 128 }
 0x97e   :  { %2179 = vsyncpa [#allocation4], 1 }
 0x97f   :  { %2181 = vsyncpa [#allocation4 + $0x1], 1 }
 0x980   :  { %2182 = vsyncpa [#allocation7], 1 }
 0x981   :  { %2183 = vsyncpa [#allocation10], 1 }
 0x982   :  { %2184 = vsyncpa [#allocation13], 1 }
 0x983   :  { %2185 = vsyncpa [#allocation5], 1 }
 0x984   :  { %2187 = vsyncpa [#allocation5 + $0x1], 1 }

</bundles_post_ra>
